<compile_context>
chip_gen: v7x
topology: tpu7x:2x2x1
jax: 0.10.0
libtpu: 0.0.40
codegen_flags: <defaults>
</compile_context>

<pallas_src>
import jax
import jax.numpy as jnp
from jax.experimental import pallas as pl
from jax.experimental.pallas import tpu as pltpu


def _round_up(x, m):
    return -(-x // m) * m


def _lane_pack_factor(feature_size):
    """How many edges pack into one 128-lane row (free row-major reshape)."""
    if feature_size < 128 and 128 % feature_size == 0:
        return 128 // feature_size
    return 1


def _pick_edge_tile(num_edges, r, requested=None, cap=4096):
    """Tile size in edges: multiple of 8*r, and >= 2 grid steps when possible."""
    unit = 8 * r
    if requested is not None:
        return max(unit, _round_up(requested, unit))
    t = min(_round_up(cap, unit), _round_up(num_edges, unit))
    # Guarantee at least 2 grid steps when there is enough work: lets the
    # "parallel" axis shard across both v7x TensorCores and gives the
    # pipeline something to overlap.
    if _round_up(num_edges, unit) >= 2 * unit and _round_up(num_edges, t) // t < 2:
        t = _round_up(-(-num_edges // 2), unit)
    return max(t, unit)


def _cross_modal_kernel(s0, s1, s2, d0, d1, d2, wbd_ref, sel_ref, out_ref):
    # s*/d*:   (TE//r, r*F) packed edge tiles (input dtype, f32 or bf16)
    # wbd_ref: (3, r*F, r*F) f32 block-diagonal per-modality weights
    # sel_ref: (r*F, r*H) f32 head-sum selection matrix
    # out_ref: (3, TE//r, r*H) f32 softmax-over-modality scores
    sel = sel_ref[...]
    srcs = (s0, s1, s2)
    dsts = (d0, d1, d2)

    att = []
    for m in range(3):          # static unroll; forward hard-codes 3 modalities
        # key = src @ W_blockdiag  -> one 128-wide MXU matmul per modality
        key = jnp.dot(srcs[m][...], wbd_ref[m],
                      preferred_element_type=jnp.float32)            # (T, rF)
        p = dsts[m][...].astype(jnp.float32) * key                   # VPU
        # per-head sum over d_k via a second MXU matmul (no lane-group reduce)
        att.append(jnp.dot(p, sel, preferred_element_type=jnp.float32))  # (T, rH)

    # Softmax over the modality axis, elementwise on the three slabs.
    mx = jnp.maximum(jnp.maximum(att[0], att[1]), att[2])
    e0 = jnp.exp(att[0] - mx)
    e1 = jnp.exp(att[1] - mx)
    e2 = jnp.exp(att[2] - mx)
    inv = 1.0 / (e0 + e1 + e2)          # exact divide: columns sum to 1 exactly
    out_ref[0, :, :] = (e0 * inv).astype(out_ref.dtype)
    out_ref[1, :, :] = (e1 * inv).astype(out_ref.dtype)
    out_ref[2, :, :] = (e2 * inv).astype(out_ref.dtype)


def prepare_weights(weights, rel_id, modal_order, num_head, d_k):
    """Hoistable / cachable per-(weights, rel_id) preparation.

    Returns:
      wbd: (3, r*F, r*F) f32 — r copies of the per-head block-diagonal (F,F)
           weight, per modality.  Kept in f32 even for bf16 edge features.
      sel: (r*F, r*H) f32 — 0/1 head-sum selection matrix.
    """
    F = num_head * d_k
    r = _lane_pack_factor(F)
    eye_h = jnp.eye(num_head, dtype=jnp.float32)
    eye_r = jnp.eye(r, dtype=jnp.float32)
    blocks = []
    for k in modal_order:
        w = weights[k][rel_id].astype(jnp.float32)                    # (H,dk,dk)
        wbd_f = jnp.einsum("hji,hk->hjki", w, eye_h).reshape(F, F)    # head blockdiag
        blocks.append(jnp.kron(eye_r, wbd_f))                         # (rF, rF)
    wbd = jnp.stack(blocks, axis=0)                                   # (3, rF, rF)
    sel = jnp.kron(eye_r, jnp.repeat(eye_h, d_k, axis=0))             # (rF, rH)
    return wbd, sel


def cross_modal_forward(src_feats, dst_feats, wbd, sel, modal_order, num_head,
                        *, edge_tile=None, edge_tile_cap=4096,
                        vmem_limit_bytes=32 * 1024 * 1024):
    """src_feats/dst_feats: dict modality -> (E, H, dk) edge features (f32/bf16).
       wbd, sel: from prepare_weights().  Returns (3, E, H) f32 softmax scores."""
    assert len(modal_order) == 3, "forward hard-codes 3 modalities"
    E, H, d_k = src_feats[modal_order[0]].shape
    assert H == num_head
    F = H * d_k
    r = _lane_pack_factor(F)

    tile = _pick_edge_tile(E, r, edge_tile, edge_tile_cap)
    E_pad = _round_up(E, tile)

    def pack(x):
        if E_pad != E:
            x = jnp.pad(x, ((0, E_pad - E), (0, 0), (0, 0)))
        return x.reshape(E_pad // r, r * F)          # free row-major reshape

    srcs = [pack(src_feats[k]) for k in modal_order]
    dsts = [pack(dst_feats[k]) for k in modal_order]

    rows = tile // r                                 # packed rows per grid step
    edge_spec = pl.BlockSpec((rows, r * F), lambda i: (i, 0))
    # NOTE: with large tiles, pipeline_mode=pl.Buffered(3) on the six edge specs
    # is a small extra knob worth sweeping; default double-buffering kept here.

    out = pl.pallas_call(
        _cross_modal_kernel,
        out_shape=jax.ShapeDtypeStruct((3, E_pad // r, r * H), jnp.float32),
        grid_spec=pltpu.PrefetchScalarGridSpec(
            num_scalar_prefetch=0,
            grid=(E_pad // tile,),
            in_specs=[edge_spec] * 6 + [
                pl.BlockSpec((3, r * F, r * F), lambda i: (0, 0, 0)),
                pl.BlockSpec((r * F, r * H), lambda i: (0, 0)),
            ],
            out_specs=pl.BlockSpec((3, rows, r * H), lambda i: (0, i, 0)),
        ),
        compiler_params=pltpu.CompilerParams(
            dimension_semantics=("parallel",),
            vmem_limit_bytes=vmem_limit_bytes),
    )(*srcs, *dsts, wbd, sel)

    out = out.reshape(3, E_pad, H)                   # free view back to PyTorch layout
    if E_pad != E:
        out = out[:, :E, :]                          # drop padded edges
    return out


def cross_modal_layer(src_feats, dst_feats, weights, rel_id, *, edge_tile=None,
                      edge_tile_cap=4096):
    """Convenience wrapper (prefer caching prepare_weights per rel_id)."""
    modal_order = list(src_feats.keys())
    E, H, d_k = src_feats[modal_order[0]].shape
    wbd, sel = prepare_weights(weights, rel_id, modal_order, H, d_k)
    return cross_modal_forward(src_feats, dst_feats, wbd, sel, modal_order, H,
                               edge_tile=edge_tile, edge_tile_cap=edge_tile_cap)


def _reference(src_feats, dst_feats, weights, rel_id):
    scores = []
    for k in src_feats:
        key = jnp.einsum("ehd,hdk->ehk",
                         src_feats[k].astype(jnp.float32),
                         weights[k][rel_id].astype(jnp.float32),
                         precision=jax.lax.Precision.HIGHEST)
        scores.append(jnp.sum(dst_feats[k].astype(jnp.float32) * key, axis=-1))
    return jax.nn.softmax(jnp.stack(scores, axis=0), axis=0)


if __name__ == "__main__":
    # Small shapes consistent with the module.
    num_modalities = 3          # text, img, transh (forward hard-codes 3)
    feature_size = 32
    num_head = 4
    d_k = feature_size // num_head
    num_relation = 2
    E = 1024
    rel_id = 1

    key = jax.random.PRNGKey(0)
    keys = jax.random.split(key, 9)
    modals = ["text", "img", "transh"]

    # module __init__: randn(num_relation, H, dk, dk) per modality
    weights = {
        m: jax.random.normal(keys[i], (num_relation, num_head, d_k, d_k), jnp.float32)
        for i, m in enumerate(modals)
    }
    # edge features: g.edata['src_*'][ntype] / g.edata['dst_*'][ntype], each (E, H, dk)
    src_feats = {
        m: jax.random.normal(keys[3 + i], (E, num_head, d_k), jnp.float32)
        for i, m in enumerate(modals)
    }
    dst_feats = {
        m: jax.random.normal(keys[6 + i], (E, num_head, d_k), jnp.float32)
        for i, m in enumerate(modals)
    }

    # Hoisted weight prep (cache per rel_id in real use).
    wbd, sel = prepare_weights(weights, rel_id, modals, num_head, d_k)

    # f32 run: auto tile -> 512 edges/step, 2 "parallel" grid steps, r=4 packing.
    out = cross_modal_forward(src_feats, dst_feats, wbd, sel, modals, num_head)
    out = jax.block_until_ready(out)
    ref = _reference(src_feats, dst_feats, weights, rel_id)
    assert out.shape == (num_modalities, E, num_head)
    assert jnp.allclose(out, ref, atol=2e-3, rtol=2e-3), "f32 mismatch vs reference"

    # bf16 edge features (HBM-roofline lever) with ragged E -> exercises padding.
    E2 = 1000
    src_bf16 = {m: v[:E2].astype(jnp.bfloat16) for m, v in src_feats.items()}
    dst_bf16 = {m: v[:E2].astype(jnp.bfloat16) for m, v in dst_feats.items()}
    out2 = cross_modal_forward(src_bf16, dst_bf16, wbd, sel, modals, num_head)
    out2 = jax.block_until_ready(out2)
    ref2 = _reference(src_bf16, dst_bf16, weights, rel_id)
    assert out2.shape == (num_modalities, E2, num_head)
    assert jnp.allclose(out2, ref2, atol=5e-3, rtol=5e-3), "bf16 mismatch vs reference"

    print("KERNEL_OK")
</pallas_src>

<mosaic_0001>
module attributes {stable_mosaic.version = 11 : i64} {
  func.func @_cross_modal_kernel(%arg0: i32, %arg1: memref<128x128xf32, #tpu.memory_space<vmem>>, %arg2: memref<128x128xf32, #tpu.memory_space<vmem>>, %arg3: memref<128x128xf32, #tpu.memory_space<vmem>>, %arg4: memref<128x128xf32, #tpu.memory_space<vmem>>, %arg5: memref<128x128xf32, #tpu.memory_space<vmem>>, %arg6: memref<128x128xf32, #tpu.memory_space<vmem>>, %arg7: memref<3x128x128xf32, #tpu.memory_space<vmem>>, %arg8: memref<128x16xf32, #tpu.memory_space<vmem>>, %arg9: memref<3x128x16xf32, #tpu.memory_space<vmem>>) attributes {dimension_semantics = [#tpu.dimension_semantics<parallel>], iteration_bounds = array<i64: 2>, scalar_prefetch = 0 : i64, scratch_operands = 0 : i64, tpu.core_type = #tpu.core_type<tc>, window_params = [{transform_indices = @transform_0, window_bounds = array<i64: 128, 128>}, {transform_indices = @transform_1, window_bounds = array<i64: 128, 128>}, {transform_indices = @transform_2, window_bounds = array<i64: 128, 128>}, {transform_indices = @transform_3, window_bounds = array<i64: 128, 128>}, {transform_indices = @transform_4, window_bounds = array<i64: 128, 128>}, {transform_indices = @transform_5, window_bounds = array<i64: 128, 128>}, {pipeline_mode = #tpu.pipeline_mode<synchronous>, transform_indices = @transform_6, window_bounds = array<i64: 3, 128, 128>}, {pipeline_mode = #tpu.pipeline_mode<synchronous>, transform_indices = @transform_7, window_bounds = array<i64: 128, 16>}, {transform_indices = @transform_8, window_bounds = array<i64: 3, 128, 16>}]} {
    %c0 = arith.constant 0 : index
    %c0_0 = arith.constant 0 : index
    %0 = vector.load %arg8[%c0, %c0_0] : memref<128x16xf32, #tpu.memory_space<vmem>>, vector<128x16xf32>
    %c0_1 = arith.constant 0 : index
    %c0_2 = arith.constant 0 : index
    %1 = vector.load %arg1[%c0_1, %c0_2] : memref<128x128xf32, #tpu.memory_space<vmem>>, vector<128x128xf32>
    %c0_3 = arith.constant 0 : index
    %c0_4 = arith.constant 0 : index
    %c0_5 = arith.constant 0 : index
    %2 = vector.load %arg7[%c0_3, %c0_4, %c0_5] : memref<3x128x128xf32, #tpu.memory_space<vmem>>, vector<1x128x128xf32>
    %3 = vector.shape_cast %2 : vector<1x128x128xf32> to vector<128x128xf32>
    %cst = arith.constant dense<0.000000e+00> : vector<128x128xf32>
    %4 = tpu.matmul %1, %3, %cst {dimension_numbers = #tpu.dot_dimension_numbers<[1], [0], [0], [1], [0, 0, 1, 1], [], []>} : vector<128x128xf32>, vector<128x128xf32>, vector<128x128xf32> -> vector<128x128xf32>
    %c0_6 = arith.constant 0 : index
    %c0_7 = arith.constant 0 : index
    %5 = vector.load %arg4[%c0_6, %c0_7] : memref<128x128xf32, #tpu.memory_space<vmem>>, vector<128x128xf32>
    %6 = arith.mulf %5, %4 : vector<128x128xf32>
    %cst_8 = arith.constant dense<0.000000e+00> : vector<128x16xf32>
    %7 = tpu.matmul %6, %0, %cst_8 {dimension_numbers = #tpu.dot_dimension_numbers<[1], [0], [0], [1], [0, 0, 1, 1], [], []>} : vector<128x128xf32>, vector<128x16xf32>, vector<128x16xf32> -> vector<128x16xf32>
    %c0_9 = arith.constant 0 : index
    %c0_10 = arith.constant 0 : index
    %8 = vector.load %arg2[%c0_9, %c0_10] : memref<128x128xf32, #tpu.memory_space<vmem>>, vector<128x128xf32>
    %c1 = arith.constant 1 : index
    %c0_11 = arith.constant 0 : index
    %c0_12 = arith.constant 0 : index
    %9 = vector.load %arg7[%c1, %c0_11, %c0_12] : memref<3x128x128xf32, #tpu.memory_space<vmem>>, vector<1x128x128xf32>
    %10 = vector.shape_cast %9 : vector<1x128x128xf32> to vector<128x128xf32>
    %cst_13 = arith.constant dense<0.000000e+00> : vector<128x128xf32>
    %11 = tpu.matmul %8, %10, %cst_13 {dimension_numbers = #tpu.dot_dimension_numbers<[1], [0], [0], [1], [0, 0, 1, 1], [], []>} : vector<128x128xf32>, vector<128x128xf32>, vector<128x128xf32> -> vector<128x128xf32>
    %c0_14 = arith.constant 0 : index
    %c0_15 = arith.constant 0 : index
    %12 = vector.load %arg5[%c0_14, %c0_15] : memref<128x128xf32, #tpu.memory_space<vmem>>, vector<128x128xf32>
    %13 = arith.mulf %12, %11 : vector<128x128xf32>
    %cst_16 = arith.constant dense<0.000000e+00> : vector<128x16xf32>
    %14 = tpu.matmul %13, %0, %cst_16 {dimension_numbers = #tpu.dot_dimension_numbers<[1], [0], [0], [1], [0, 0, 1, 1], [], []>} : vector<128x128xf32>, vector<128x16xf32>, vector<128x16xf32> -> vector<128x16xf32>
    %c0_17 = arith.constant 0 : index
    %c0_18 = arith.constant 0 : index
    %15 = vector.load %arg3[%c0_17, %c0_18] : memref<128x128xf32, #tpu.memory_space<vmem>>, vector<128x128xf32>
    %c2 = arith.constant 2 : index
    %c0_19 = arith.constant 0 : index
    %c0_20 = arith.constant 0 : index
    %16 = vector.load %arg7[%c2, %c0_19, %c0_20] : memref<3x128x128xf32, #tpu.memory_space<vmem>>, vector<1x128x128xf32>
    %17 = vector.shape_cast %16 : vector<1x128x128xf32> to vector<128x128xf32>
    %cst_21 = arith.constant dense<0.000000e+00> : vector<128x128xf32>
    %18 = tpu.matmul %15, %17, %cst_21 {dimension_numbers = #tpu.dot_dimension_numbers<[1], [0], [0], [1], [0, 0, 1, 1], [], []>} : vector<128x128xf32>, vector<128x128xf32>, vector<128x128xf32> -> vector<128x128xf32>
    %c0_22 = arith.constant 0 : index
    %c0_23 = arith.constant 0 : index
    %19 = vector.load %arg6[%c0_22, %c0_23] : memref<128x128xf32, #tpu.memory_space<vmem>>, vector<128x128xf32>
    %20 = arith.mulf %19, %18 : vector<128x128xf32>
    %cst_24 = arith.constant dense<0.000000e+00> : vector<128x16xf32>
    %21 = tpu.matmul %20, %0, %cst_24 {dimension_numbers = #tpu.dot_dimension_numbers<[1], [0], [0], [1], [0, 0, 1, 1], [], []>} : vector<128x128xf32>, vector<128x16xf32>, vector<128x16xf32> -> vector<128x16xf32>
    %22 = arith.maximumf %7, %14 : vector<128x16xf32>
    %23 = arith.maximumf %22, %21 : vector<128x16xf32>
    %24 = arith.subf %7, %23 : vector<128x16xf32>
    %25 = math.exp %24 : vector<128x16xf32>
    %26 = arith.subf %14, %23 : vector<128x16xf32>
    %27 = math.exp %26 : vector<128x16xf32>
    %28 = arith.subf %21, %23 : vector<128x16xf32>
    %29 = math.exp %28 : vector<128x16xf32>
    %30 = arith.addf %25, %27 : vector<128x16xf32>
    %31 = arith.addf %30, %29 : vector<128x16xf32>
    %cst_25 = arith.constant 1.000000e+00 : f32
    %32 = vector.broadcast %cst_25 : f32 to vector<128x16xf32>
    %33 = arith.divf %32, %31 : vector<128x16xf32>
    %34 = arith.mulf %25, %33 : vector<128x16xf32>
    %c0_26 = arith.constant 0 : index
    %c0_27 = arith.constant 0 : index
    %c0_28 = arith.constant 0 : index
    %35 = vector.load %arg9[%c0_26, %c0_27, %c0_28] : memref<3x128x16xf32, #tpu.memory_space<vmem>>, vector<1x128x16xf32>
    %36 = vector.shape_cast %35 : vector<1x128x16xf32> to vector<128x16xf32>
    %37 = vector.shape_cast %34 : vector<128x16xf32> to vector<1x128x16xf32>
    tpu.vector_store %arg9[%c0_26, %c0_27, %c0_28], %37 {strides = array<i32>} : memref<3x128x16xf32, #tpu.memory_space<vmem>>, vector<1x128x16xf32>,
    %38 = arith.mulf %27, %33 : vector<128x16xf32>
    %c1_29 = arith.constant 1 : index
    %c0_30 = arith.constant 0 : index
    %c0_31 = arith.constant 0 : index
    %39 = vector.load %arg9[%c1_29, %c0_30, %c0_31] : memref<3x128x16xf32, #tpu.memory_space<vmem>>, vector<1x128x16xf32>
    %40 = vector.shape_cast %39 : vector<1x128x16xf32> to vector<128x16xf32>
    %41 = vector.shape_cast %38 : vector<128x16xf32> to vector<1x128x16xf32>
    tpu.vector_store %arg9[%c1_29, %c0_30, %c0_31], %41 {strides = array<i32>} : memref<3x128x16xf32, #tpu.memory_space<vmem>>, vector<1x128x16xf32>,
    %42 = arith.mulf %29, %33 : vector<128x16xf32>
    %c2_32 = arith.constant 2 : index
    %c0_33 = arith.constant 0 : index
    %c0_34 = arith.constant 0 : index
    %43 = vector.load %arg9[%c2_32, %c0_33, %c0_34] : memref<3x128x16xf32, #tpu.memory_space<vmem>>, vector<1x128x16xf32>
    %44 = vector.shape_cast %43 : vector<1x128x16xf32> to vector<128x16xf32>
    %45 = vector.shape_cast %42 : vector<128x16xf32> to vector<1x128x16xf32>
    tpu.vector_store %arg9[%c2_32, %c0_33, %c0_34], %45 {strides = array<i32>} : memref<3x128x16xf32, #tpu.memory_space<vmem>>, vector<1x128x16xf32>,
    return
  }
  func.func @transform_0(%arg0: i32) -> (i32, i32) {
    %c0_i32 = arith.constant 0 : i32
    %c0_i32_0 = arith.constant 0 : i32
    return %arg0, %c0_i32 : i32, i32
  }
  func.func @transform_1(%arg0: i32) -> (i32, i32) {
    %c0_i32 = arith.constant 0 : i32
    %c0_i32_0 = arith.constant 0 : i32
    return %arg0, %c0_i32 : i32, i32
  }
  func.func @transform_2(%arg0: i32) -> (i32, i32) {
    %c0_i32 = arith.constant 0 : i32
    %c0_i32_0 = arith.constant 0 : i32
    return %arg0, %c0_i32 : i32, i32
  }
  func.func @transform_3(%arg0: i32) -> (i32, i32) {
    %c0_i32 = arith.constant 0 : i32
    %c0_i32_0 = arith.constant 0 : i32
    return %arg0, %c0_i32 : i32, i32
  }
  func.func @transform_4(%arg0: i32) -> (i32, i32) {
    %c0_i32 = arith.constant 0 : i32
    %c0_i32_0 = arith.constant 0 : i32
    return %arg0, %c0_i32 : i32, i32
  }
  func.func @transform_5(%arg0: i32) -> (i32, i32) {
    %c0_i32 = arith.constant 0 : i32
    %c0_i32_0 = arith.constant 0 : i32
    return %arg0, %c0_i32 : i32, i32
  }
  func.func @transform_6(%arg0: i32) -> (i32, i32, i32) {
    %c0_i32 = arith.constant 0 : i32
    %c0_i32_0 = arith.constant 0 : i32
    %c0_i32_1 = arith.constant 0 : i32
    %c0_i32_2 = arith.constant 0 : i32
    return %c0_i32, %c0_i32_0, %c0_i32_1 : i32, i32, i32
  }
  func.func @transform_7(%arg0: i32) -> (i32, i32) {
    %c0_i32 = arith.constant 0 : i32
    %c0_i32_0 = arith.constant 0 : i32
    %c0_i32_1 = arith.constant 0 : i32
    return %c0_i32, %c0_i32_0 : i32, i32
  }
  func.func @transform_8(%arg0: i32) -> (i32, i32, i32) {
    %c0_i32 = arith.constant 0 : i32
    %c0_i32_0 = arith.constant 0 : i32
    %c0_i32_1 = arith.constant 0 : i32
    return %c0_i32, %arg0, %c0_i32_0 : i32, i32, i32
  }
}

</mosaic_0001>

<bundles_post_ra>
// kernel: tpu_custom_call.1
= control target key start
LH: loop header
LB: loop body
LE: loop exit
PB: predicated region body
PF: predicated region fallthrough
CT: control target
= control target key end

     0   :  { %s4834_s0 = inlined_call_operand.hbm [shape: f32[256,128], index: 0, kind: input, shape index: {}]   ;;  %s4835_s1 = inlined_call_operand.hbm [shape: f32[256,128], index: 1, kind: input, shape index: {}]   ;;  %s4836_s2 = inlined_call_operand.hbm [shape: f32[256,128], index: 2, kind: input, shape index: {}]   ;;  %s4837_s3 = inlined_call_operand.hbm [shape: f32[256,128], index: 3, kind: input, shape index: {}]   ;;  %s4838_s4 = inlined_call_operand.hbm [shape: f32[256,128], index: 4, kind: input, shape index: {}]   ;;  %s4839_s5 = inlined_call_operand.hbm [shape: f32[256,128], index: 5, kind: input, shape index: {}]   ;;  %s4840_s6 = inlined_call_operand.hbm [shape: f32[3,128,128], index: 6, kind: input, shape index: {}]   ;;  %s4841_s7 = inlined_call_operand.vmem [shape: f32[128,16], index: 7, kind: input, shape index: {}]   ;;  %s4842_s8 = inlined_call_operand.vmem [shape: f32[3,256,16], index: 8, kind: output, shape index: {}]  }
   0x1   :  { %4854 = sst [smem:[#allocation22_spill]] %s4834_s0 }
   0x2   :  { %4855 = sst [smem:[#allocation23_spill]] %s4835_s1 }
   0x3   :  { %4856 = sst [smem:[#allocation24_spill]] %s4837_s3 }
   0x4   :  { %4857 = sst [smem:[#allocation25_spill]] %s4840_s6 }
   0x5   :  { %13 = vsyncpa [#allocation3], 0 }
   0x6   :  { %15 = vsyncpa [#allocation3 + $0x1], 0 }
   0x7   :  { %16 = vsyncpa [#allocation5], 0 }
   0x8   :  { %18 = vsyncpa [#allocation5 + $0x1], 0 }
   0x9   :  { %19 = vsyncpa [#allocation8], 0 }
   0xa   :  { %21 = vsyncpa [#allocation8 + $0x1], 0 }
   0xb   :  { %22 = vsyncpa [#allocation11], 0 }
   0xc   :  { %24 = vsyncpa [#allocation11 + $0x1], 0  ;;  %s3677_s27 = smov 0   ;;  %s3679_s28 = smov 0  }
   0xd   :  { %s3681_s29 = smov 0   ;;  %s3683_s30 = smov 0  }
   0xe LB: > { %4858 = sst [smem:[#allocation19_spill]] %s3617_s29  ;;  %s3696_s9 = sadd.s32 4294967295, %s3621_s30   ;;  %s3621_s30 = sphi %s3683_s30, %s4887_s30   ;;  %s3617_s29 = sphi %s3681_s29, %s4889_s29   ;;  %s3613_s28 = sphi %s3679_s28, %s4891_s28   ;;  %s3609_s27 = sphi %s3677_s27, %s4890_s27  }
   0xf   : > { %s3699_s10 = sadd.s32 1, %s3621_s30   ;;  %s37_s12 = sadd.s32 1, %s3617_s29 }
  0x10   : > { %4859 = sst [smem:[#allocation20_spill]] %s3699_s10  ;;  %s34_s11 = ssub.s32 %s3621_s30, %s3699_s10 }
  0x11   : > { %p35_p0 = scmp.eq.s32.totalorder %s34_s11, 0  ;;  %p44_p1 = scmp.ne.s32.totalorder %s3617_s29, %s3613_s28 }
  0x12   : > { %p45_p2 = scmp.eq.s32.totalorder %s3621_s30, 0  ;;  %p50_p3 = scmp.ne.s32.totalorder %s3613_s28, %s3609_s27 }
  0x13   : > { %s3709_s13 = scalar_select %p35_p0, %s3617_s29, %s37_s12  }
  0x14   : > { %p3711_p4 = por %p45_p2, %p44_p1  ;;  %p4843_p5 = scmp.eq.s32.totalorder %s3696_s9, 0 }
  0x15   : > { %4860 = sst [smem:[#allocation21_spill]] %s3709_s13  ;;  %p246_p6 = scmp.eq.s32.totalorder %s3696_s9, 1 }
  0x16   : > { %p2365_p7 = scmp.ge.s32.totalorder %s3621_s30, 1  ;;  %p3720_p8 = por %p4843_p5, %p50_p3 }
  0x17   : > { %p259_p9 = scmp.lt.s32.totalorder %s3621_s30, 3  ;;  %p3725_p10 = por %p246_p6, %p44_p1 }
  0x18   : > { %s4862_s15 = scalar_select %p3720_p8, 1, 0 }
  0x19   : > { %s4863_s16 = scalar_select %p3725_p10, 1, 0 }
  0x1a   : > { %p3729_p11 = pnand %p2365_p7, %p259_p9  ;;  %s3623_s18 = smov [#allocation12]  }
  0x1b   : > { %s271_s19 = sshll.u32 %s3623_s18, 4  ;;  %p3198_p0 = scmp.lt.s32.totalorder %s3621_s30, 2  ;;  %s272_s19 = int_to_ptr.vmem [resolvable:$true] %s271_s19 }
  0x1c   : > { %s4864_s17 = scalar_select %p3729_p11, 1, 0 }
  0x1d   : > { %p3174_p12 = pneg %p3729_p11  ;;  %s4849_s21 = sand.u32 1, %s3617_s29  }
  0x1e   : > { %s3744_s22 = sshll.u32 %s3621_s30, 11  ;;  %p3748_p1 = pnand %p3198_p0, %p3711_p4 }
  0x1f   : > { %p3737_p13 = pnand %p3174_p12, %p4843_p5  ;;  %s4867_s6 = sld [smem:[#allocation25_spill]] }
  0x20   : > { %s4866_s23 = scalar_select %p3748_p1, 1, 0 }
  0x21   : > { %p3365_p3 = pneg %p3737_p13 }
  0x25   : > { %s3363_s26 = scalar_lea.hbm %s4867_s6, 6144 }
  0x26   : > { %p3364_p2 = scmp.ne.s32.totalorder %s4867_s6, %s3363_s26  ;;  %p3370_p9 = scmp.lt.u32.totalorder %s3363_s26, %s4867_s6 }
  0x28   : > { %p3366_p6 = pnand %p3365_p3, %p3364_p2 }
  0x2a   : > { %p3367_p7 = pneg %p3366_p6 }
  0x2c   : > { %p3372_p4 = pnand %p3370_p9, %p3367_p7 }
  0x2e   : > { %3375 = shalt.err (!%p3372_p4)
}
  0x2f   : > { %s3376_s14 = scalar_lea.vmem %s272_s19, 6144  ;;  %p3384_p10 = scmp.lt.s32.totalorder %s272_s19, %s272_s19 }
  0x30   : > { %p3377_p12 = scmp.ne.s32.totalorder %s272_s19, %s3376_s14  ;;  %p3385_p8 = scmp.lt.s32.totalorder %s3376_s14, %s3376_s14 }
  0x32   : > { %p3379_p0 = pnand %p3377_p12, %p3365_p3  ;;  %p3386_p11 = por %p3385_p8, %p3384_p10 }
  0x34   : > { %p3380_p5 = pneg %p3379_p0 }
  0x36   : > { %p3387_p1 = pnand %p3386_p11, %p3380_p5 }
  0x38   : > { %3390 = shalt.err (!%p3387_p1)
}
  0x39   : > { %s4851_s24 = smov 128   ;;  %s3625_s25 = smov 8  }
  0x3a   : > { %3177 = dma.hbm_to_vmem [thread:$0]  (!%p3737_p13), %s4867_s6, 6144, %s272_s19, [#allocation11], %s4851_s24, %s4851_s24, %s3625_s25  }
  0x3b   : > { %s3773_s11 = sshll.u32 %s4849_s21, 7  ;;  %s3776_s12 = sand.u32 1, %s3621_s30  }
  0x3c   : > { %s4868_s1 = sld [smem:[#allocation23_spill]]  ;;  %s313_s20 = scalar_lea.vmem [#allocation4], %s3773_s11 }
  0x3d   : > { %s320_s10 = sshll.u32 %s313_s20, 4  ;;  %p4869_p8 = scmp.ne.s32.totalorder %s4866_s23, 0  ;;  %s3785_s10 = int_to_ptr.vmem [resolvable:$true] %s320_s10 }
  0x3f   : > { %p3792_p10 = pneg %p4869_p8 }
  0x42   : > { %s3782_s13 = scalar_lea.hbm %s4868_s1, %s3744_s22  ;;  %s3396_s14 = scalar_lea.hbm %s4868_s1, 4096 }
  0x43   : > { %s3391_s26 = scalar_lea.hbm %s3782_s13, 2048  ;;  %p3397_p1 = scmp.lt.u32.totalorder %s3782_s13, %s4868_s1 }
  0x44   : > { %p3392_p5 = scmp.ne.s32.totalorder %s3782_s13, %s3391_s26  ;;  %p3398_p2 = scmp.lt.u32.totalorder %s3396_s14, %s3391_s26 }
  0x45   : > { %p3400_p6 = scmp.lt.u32.totalorder %s3391_s26, %s3782_s13 }
  0x46   : > { %p3394_p11 = pnand %p3792_p10, %p3392_p5  ;;  %p3399_p3 = por %p3398_p2, %p3397_p1 }
  0x48   : > { %p3395_p13 = pneg %p3394_p11  ;;  %p3401_p7 = por %p3400_p6, %p3399_p3 }
  0x4a   : > { %p3402_p9 = pnand %p3401_p7, %p3395_p13 }
  0x4c   : > { %3405 = shalt.err (!%p3402_p9)
}
  0x4d   : > { %s3406_s19 = scalar_lea.vmem %s3785_s10, 2048  ;;  %s3626_s27 = smov [#allocation4]  }
  0x4e   : > { %p3407_p4 = scmp.ne.s32.totalorder %s3785_s10, %s3406_s19  ;;  %s3411_s18 = sshll.u32 %s3626_s27, 4  ;;  %s3412_s18 = int_to_ptr.vmem [resolvable:$false] %s3411_s18 }
  0x4f   : > { %s3413_s21 = scalar_lea.vmem %s3412_s18, 4096  ;;  %p3414_p5 = scmp.lt.s32.totalorder %s3785_s10, %s3412_s18 }
  0x50   : > { %p3409_p12 = pnand %p3407_p4, %p3792_p10  ;;  %p3415_p11 = scmp.lt.s32.totalorder %s3413_s21, %s3406_s19 }
  0x52   : > { %p3410_p0 = pneg %p3409_p12  ;;  %p3416_p1 = por %p3415_p11, %p3414_p5 }
  0x54   : > { %p3417_p2 = pnand %p3416_p1, %p3410_p0 }
  0x56   : > { %3420 = shalt.err (!%p3417_p2)
}
  0x57   : > { %s4871_s26 = scalar_lea.sflag [#allocation5], %s3776_s12  ;;  %s4872_s3 = sld [smem:[#allocation24_spill]] }
  0x58   : > { %3184 = dma.hbm_to_vmem [thread:$0]  (!%p4869_p8), %s3782_s13, 2048, %s3785_s10, %s4871_s26, %s4851_s24, %s4851_s24, %s3625_s25  }
  0x59   : > { %s355_s27 = scalar_lea.vmem [#allocation7], %s3773_s11  ;;  %s4850_s21 = scalar_lea.sflag [#allocation8], %s3776_s12 }
  0x5a   : > { %s362_s18 = sshll.u32 %s355_s27, 4  ;;  %s3827_s18 = int_to_ptr.vmem [resolvable:$true] %s362_s18 }
  0x5d   : > { %s3824_s19 = scalar_lea.hbm %s4872_s3, %s3744_s22  ;;  %s3426_s26 = scalar_lea.hbm %s4872_s3, 4096 }
  0x5e   : > { %s3421_s1 = scalar_lea.hbm %s3824_s19, 2048  ;;  %p3427_p7 = scmp.lt.u32.totalorder %s3824_s19, %s4872_s3 }
  0x5f   : > { %p3422_p13 = scmp.ne.s32.totalorder %s3824_s19, %s3421_s1  ;;  %p3428_p9 = scmp.lt.u32.totalorder %s3426_s26, %s3421_s1 }
  0x60   : > { %p3430_p12 = scmp.lt.u32.totalorder %s3421_s1, %s3824_s19 }
  0x61   : > { %p3424_p3 = pnand %p3422_p13, %p3792_p10  ;;  %p3429_p4 = por %p3428_p9, %p3427_p7 }
  0x63   : > { %p3425_p6 = pneg %p3424_p3  ;;  %p3431_p0 = por %p3430_p12, %p3429_p4 }
  0x65   : > { %p3432_p5 = pnand %p3431_p0, %p3425_p6 }
  0x67   : > { %3435 = shalt.err (!%p3432_p5)
}
  0x68   : > { %s3436_s27 = scalar_lea.vmem %s3827_s18, 2048  ;;  %s3627_s10 = smov [#allocation7]  }
  0x69   : > { %p3437_p11 = scmp.ne.s32.totalorder %s3827_s18, %s3436_s27  ;;  %s3441_s13 = sshll.u32 %s3627_s10, 4  ;;  %s3442_s13 = int_to_ptr.vmem [resolvable:$false] %s3441_s13 }
  0x6a   : > { %s3443_s14 = scalar_lea.vmem %s3442_s13, 4096  ;;  %p3444_p13 = scmp.lt.s32.totalorder %s3827_s18, %s3442_s13 }
  0x6b   : > { %p3439_p1 = pnand %p3437_p11, %p3792_p10  ;;  %p3445_p3 = scmp.lt.s32.totalorder %s3443_s14, %s3436_s27 }
  0x6d   : > { %p3440_p2 = pneg %p3439_p1  ;;  %p3446_p7 = por %p3445_p3, %p3444_p13 }
  0x6f   : > { %p3447_p9 = pnand %p3446_p7, %p3440_p2 }
  0x71   : > { %3450 = shalt.err (!%p3447_p9)
}
  0x72   : > { %3190 = dma.hbm_to_vmem [thread:$0]  (!%p4869_p8), %s3824_s19, 2048, %s3827_s18, %s4850_s21, %s4851_s24, %s4851_s24, %s3625_s25  }
  0x73   : > { %s4873_s0 = sld [smem:[#allocation22_spill]]  ;;  %s292_s27 = scalar_lea.vmem [#allocation2], %s3773_s11 }
  0x74   : > { %s299_s10 = sshll.u32 %s292_s27, 4  ;;  %s3869_s3 = scalar_lea.hbm %s4836_s2, %s3744_s22  ;;  %s3863_s10 = int_to_ptr.vmem [resolvable:$true] %s299_s10 }
  0x75   : > { %s4874_s6 = sand.u32 1, %s3617_s29  }
  0x76   : > { %s3873_s19 = scalar_lea.sflag [#allocation3], %s4874_s6 }
  0x79   : > { %s3860_s20 = scalar_lea.hbm %s4873_s0, %s3744_s22  ;;  %s3456_s21 = scalar_lea.hbm %s4873_s0, 4096 }
  0x7a   : > { %s3451_s18 = scalar_lea.hbm %s3860_s20, 2048  ;;  %p3457_p0 = scmp.lt.u32.totalorder %s3860_s20, %s4873_s0 }
  0x7b   : > { %p3452_p6 = scmp.ne.s32.totalorder %s3860_s20, %s3451_s18  ;;  %p3458_p5 = scmp.lt.u32.totalorder %s3456_s21, %s3451_s18 }
  0x7c   : > { %p3460_p1 = scmp.lt.u32.totalorder %s3451_s18, %s3860_s20 }
  0x7d   : > { %p3454_p4 = pnand %p3452_p6, %p3792_p10  ;;  %p3459_p11 = por %p3458_p5, %p3457_p0 }
  0x7f   : > { %p3455_p12 = pneg %p3454_p4  ;;  %p3461_p2 = por %p3460_p1, %p3459_p11 }
  0x81   : > { %p3462_p13 = pnand %p3461_p2, %p3455_p12 }
  0x83   : > { %3465 = shalt.err (!%p3462_p13)
}
  0x84   : > { %s3466_s6 = scalar_lea.vmem %s3863_s10, 2048  ;;  %s3628_s13 = smov [#allocation2]  }
  0x85   : > { %p3467_p3 = scmp.ne.s32.totalorder %s3863_s10, %s3466_s6  ;;  %s3471_s14 = sshll.u32 %s3628_s13, 4  ;;  %s3472_s14 = int_to_ptr.vmem [resolvable:$false] %s3471_s14 }
  0x86   : > { %s3473_s24 = scalar_lea.vmem %s3472_s14, 4096  ;;  %p3474_p6 = scmp.lt.s32.totalorder %s3863_s10, %s3472_s14 }
  0x87   : > { %p3469_p7 = pnand %p3467_p3, %p3792_p10  ;;  %p3475_p4 = scmp.lt.s32.totalorder %s3473_s24, %s3466_s6 }
  0x89   : > { %p3470_p9 = pneg %p3469_p7  ;;  %p3476_p0 = por %p3475_p4, %p3474_p6 }
  0x8b   : > { %p3477_p5 = pnand %p3476_p0, %p3470_p9 }
  0x8d   : > { %3480 = shalt.err (!%p3477_p5)
}
  0x8e   : > { %s4875_s21 = smov 128   ;;  %s334_s18 = scalar_lea.vmem [#allocation6], %s3773_s11 }
  0x8f   : > { %3181 = dma.hbm_to_vmem [thread:$0]  (!%p4869_p8), %s3860_s20, 2048, %s3863_s10, %s3873_s19, %s4875_s21, %s4875_s21, %s3625_s25  }
  0x90   : > { %s341_s1 = sshll.u32 %s334_s18, 4  ;;  %s3907_s6 = scalar_lea.hbm %s4838_s4, %s3744_s22  ;;  %s3901_s1 = int_to_ptr.vmem [resolvable:$true] %s341_s1 }
  0x91   : > { %s3481_s13 = scalar_lea.hbm %s3869_s3, 2048  ;;  %s3486_s0 = scalar_lea.hbm %s4836_s2, 4096 }
  0x92   : > { %p3482_p12 = scmp.ne.s32.totalorder %s3869_s3, %s3481_s13  ;;  %p3487_p2 = scmp.lt.u32.totalorder %s3869_s3, %s4836_s2 }
  0x93   : > { %p3488_p13 = scmp.lt.u32.totalorder %s3486_s0, %s3481_s13  ;;  %p3490_p7 = scmp.lt.u32.totalorder %s3481_s13, %s3869_s3 }
  0x94   : > { %p3484_p11 = pnand %p3482_p12, %p3792_p10 }
  0x95   : > { %p3489_p3 = por %p3488_p13, %p3487_p2 }
  0x96   : > { %p3485_p1 = pneg %p3484_p11 }
  0x97   : > { %p3491_p9 = por %p3490_p7, %p3489_p3 }
  0x99   : > { %p3492_p6 = pnand %p3491_p9, %p3485_p1 }
  0x9b   : > { %3495 = shalt.err (!%p3492_p6)
}
  0x9c   : > { %s3496_s10 = scalar_lea.vmem %s3901_s1, 2048  ;;  %s3629_s19 = smov [#allocation6]  }
  0x9d   : > { %p3497_p4 = scmp.ne.s32.totalorder %s3901_s1, %s3496_s10  ;;  %s3501_s18 = sshll.u32 %s3629_s19, 4  ;;  %s3502_s18 = int_to_ptr.vmem [resolvable:$false] %s3501_s18 }
  0x9e   : > { %s3503_s29 = scalar_lea.vmem %s3502_s18, 4096  ;;  %p3504_p12 = scmp.lt.s32.totalorder %s3901_s1, %s3502_s18 }
  0x9f   : > { %p3499_p0 = pnand %p3497_p4, %p3792_p10  ;;  %p3505_p11 = scmp.lt.s32.totalorder %s3503_s29, %s3496_s10 }
  0xa1   : > { %p3500_p5 = pneg %p3499_p0  ;;  %p3506_p2 = por %p3505_p11, %p3504_p12 }
  0xa3   : > { %p3507_p13 = pnand %p3506_p2, %p3500_p5 }
  0xa5   : > { %3510 = shalt.err (!%p3507_p13)
}
  0xa6   : > { %s4876_s0 = scalar_lea.sflag [#allocation5], %s3776_s12  ;;  %s376_s26 = scalar_lea.vmem [#allocation9], %s3773_s11 }
  0xa7   : > { %3187 = dma.hbm_to_vmem [thread:$0]  (!%p4869_p8), %s3869_s3, 2048, %s3901_s1, %s4876_s0, %s4875_s21, %s4875_s21, %s3625_s25  }
  0xa8   : > { %s383_s27 = sshll.u32 %s376_s26, 4  ;;  %s3511_s13 = scalar_lea.hbm %s3907_s6, 2048  ;;  %s3936_s27 = int_to_ptr.vmem [resolvable:$true] %s383_s27 }
  0xa9   : > { %p3512_p1 = scmp.ne.s32.totalorder %s3907_s6, %s3511_s13  ;;  %s3516_s20 = scalar_lea.hbm %s4838_s4, 4096 }
  0xaa   : > { %p3517_p9 = scmp.lt.u32.totalorder %s3907_s6, %s4838_s4  ;;  %p3518_p6 = scmp.lt.u32.totalorder %s3516_s20, %s3511_s13 }
  0xab   : > { %p3514_p3 = pnand %p3512_p1, %p3792_p10  ;;  %p3520_p0 = scmp.lt.u32.totalorder %s3511_s13, %s3907_s6 }
  0xac   : > { %p3519_p4 = por %p3518_p6, %p3517_p9 }
  0xad   : > { %p3515_p7 = pneg %p3514_p3 }
  0xae   : > { %p3521_p5 = por %p3520_p0, %p3519_p4 }
  0xb0   : > { %p3522_p12 = pnand %p3521_p5, %p3515_p7 }
  0xb2   : > { %3525 = shalt.err (!%p3522_p12)
}
  0xb3   : > { %s3526_s3 = scalar_lea.vmem %s3936_s27, 2048  ;;  %s3630_s1 = smov [#allocation9]  }
  0xb4   : > { %p3527_p11 = scmp.ne.s32.totalorder %s3936_s27, %s3526_s3  ;;  %s3531_s18 = sshll.u32 %s3630_s1, 4  ;;  %s3532_s18 = int_to_ptr.vmem [resolvable:$false] %s3531_s18 }
  0xb5   : > { %s3533_s29 = scalar_lea.vmem %s3532_s18, 4096  ;;  %p3534_p1 = scmp.lt.s32.totalorder %s3936_s27, %s3532_s18 }
  0xb6   : > { %p3529_p2 = pnand %p3527_p11, %p3792_p10  ;;  %p3535_p3 = scmp.lt.s32.totalorder %s3533_s29, %s3526_s3 }
  0xb8   : > { %p3530_p13 = pneg %p3529_p2  ;;  %p3536_p9 = por %p3535_p3, %p3534_p1 }
  0xba   : > { %p3537_p6 = pnand %p3536_p9, %p3530_p13 }
  0xbc   : > { %3540 = shalt.err (!%p3537_p6)
}
  0xbd   : > { %s4877_s0 = scalar_lea.sflag [#allocation8], %s3776_s12  ;;  %s3968_s14 = scalar_lea.hbm %s4839_s5, %s3744_s22 }
  0xbe   : > { %3193 = dma.hbm_to_vmem [thread:$0]  (!%p4869_p8), %s3907_s6, 2048, %s3936_s27, %s4877_s0, %s4875_s21, %s4875_s21, %s3625_s25  }
  0xbf   : > { %s397_s24 = scalar_lea.vmem [#allocation10], %s3773_s11  ;;  %s394_s10 = scalar_lea.sflag [#allocation11], %s3776_s12 }
  0xc0   : > { %s404_s20 = sshll.u32 %s397_s24, 4  ;;  %s3541_s19 = scalar_lea.hbm %s3968_s14, 2048  ;;  %s3971_s20 = int_to_ptr.vmem [resolvable:$true] %s404_s20 }
  0xc1   : > { %p3542_p7 = scmp.ne.s32.totalorder %s3968_s14, %s3541_s19  ;;  %s3546_s3 = scalar_lea.hbm %s4839_s5, 4096 }
  0xc2   : > { %p3547_p5 = scmp.lt.u32.totalorder %s3968_s14, %s4839_s5  ;;  %p3548_p12 = scmp.lt.u32.totalorder %s3546_s3, %s3541_s19 }
  0xc3   : > { %p3544_p4 = pnand %p3542_p7, %p3792_p10  ;;  %p3550_p2 = scmp.lt.u32.totalorder %s3541_s19, %s3968_s14 }
  0xc4   : > { %p3549_p11 = por %p3548_p12, %p3547_p5 }
  0xc5   : > { %p3545_p0 = pneg %p3544_p4 }
  0xc6   : > { %p3551_p13 = por %p3550_p2, %p3549_p11 }
  0xc8   : > { %p3552_p1 = pnand %p3551_p13, %p3545_p0 }
  0xca   : > { %3555 = shalt.err (!%p3552_p1)
}
  0xcb   : > { %s3556_s11 = scalar_lea.vmem %s3971_s20, 2048  ;;  %s3631_s18 = smov [#allocation10]  }
  0xcc   : > { %p3557_p3 = scmp.ne.s32.totalorder %s3971_s20, %s3556_s11  ;;  %s3561_s29 = sshll.u32 %s3631_s18, 4  ;;  %s3562_s29 = int_to_ptr.vmem [resolvable:$false] %s3561_s29 }
  0xcd   : > { %s3563_s0 = scalar_lea.vmem %s3562_s29, 4096  ;;  %p3564_p7 = scmp.lt.s32.totalorder %s3971_s20, %s3562_s29 }
  0xce   : > { %p3559_p9 = pnand %p3557_p3, %p3792_p10  ;;  %p3565_p4 = scmp.lt.s32.totalorder %s3563_s0, %s3556_s11 }
  0xd0   : > { %p3560_p6 = pneg %p3559_p9  ;;  %p3566_p5 = por %p3565_p4, %p3564_p7 }
  0xd2   : > { %p3567_p12 = pnand %p3566_p5, %p3560_p6 }
  0xd4   : > { %3570 = shalt.err (!%p3567_p12)
}
  0xd5   : > { %3196 = dma.hbm_to_vmem [thread:$0]  (!%p4869_p8), %s3968_s14, 2048, %s3971_s20, %s394_s10, %s4875_s21, %s4875_s21, %s3625_s25  }
  0xd6   : > { %p4878_p10 = scmp.ne.s32.totalorder %s4864_s17, 0 }
  0xd7   : > { %s4003_s30 = sand.u32 (!%p4878_p10), 1, %s3613_s28   ;;  %p4879_p0 = scmp.ne.s32.totalorder (!%p4878_p10), %s4862_s15, 0 }
  0xd8   : > { %416 = sbr.rel (%p4878_p10) target bundleno = 872 (0x368), region = 52  ;;  %s2387_s26 = sshll.u32 (!%p4878_p10), %s4003_s30, 7 }
  0xd9   : > { %s419_s13 = scalar_lea.sflag (!%p4878_p10), [#allocation3], %s4003_s30  ;;  %s4007_s23 = scalar_lea.vmem (!%p4878_p10), [#allocation2], %s2387_s26 }
  0xdf   : > { %3588 = dma.done.wait (%p4879_p0), %s419_s13, 2048  }
  0xe0   : > { %3590 = vsyncadd (%p4879_p0), %s419_s13, 4294965248  ;;  %s427_s25 = sand.u32 1, %s3696_s9   ;;  %s4014_s12 = scalar_lea.vmem [#allocation4], %s2387_s26 }
  0xe1   : > { %s428_s17 = scalar_lea.sflag [#allocation5], %s427_s25 }
  0xe2   : > { %3592 = dma.done.wait (%p4879_p0), %s428_s17, 4096  }
  0xe3   : > { %3594 = vsyncadd (%p4879_p0), %s428_s17, 4294963200  ;;  %s4020_s21 = scalar_lea.vmem [#allocation6], %s2387_s26  ;;  %s446_s14 = scalar_lea.sflag [#allocation8], %s427_s25 }
  0xe4   : > { %s4022_s24 = scalar_lea.vmem [#allocation7], %s2387_s26 }
  0xe5   : > { %3596 = dma.done.wait (%p4879_p0), %s446_s14, 4096  }
  0xe6   : > { %3598 = vsyncadd (%p4879_p0), %s446_s14, 4294963200  ;;  %s4028_s20 = scalar_lea.vmem [#allocation9], %s2387_s26  ;;  %s464_s10 = scalar_lea.sflag [#allocation11], %s427_s25 }
  0xe7   : > { %s4030_s19 = scalar_lea.vmem [#allocation10], %s2387_s26 }
  0xe8   : > { %3600 = dma.done.wait (%p4879_p0), %s464_s10, 2048  }
  0xe9   : > { %3602 = vsyncadd (%p4879_p0), %s464_s10, 4294965248  ;;  %p4880_p8 = scmp.eq.s32.totalorder %s3696_s9, 0 }
  0xeb   : > { %3604 = dma.done.wait (%p4880_p8), [#allocation11], 6144   ;;  %p4881_p11 = pmov %p4880_p8 }
  0xec   : > { %v567_v0 = vld [vmem:[#allocation12] sm:$0xff]  ;;  %v568_v1 = vld [vmem:[#allocation12 + $0x8] sm:$0xff]  ;;  %v569_v2 = vld [vmem:[#allocation12 + $0x10] sm:$0xff]  ;;  %vm1871_vm0 = vcmask 130048   ;;  %p4886_p2 = scmp.ne.s32.totalorder %s4863_s16, 0 }
  0xed   : > { %3606 = vsyncadd (%p4881_p11), [#allocation11], 4294961152  ;;  %v2965_v3 = vpack.c.bf16 %v568_v1, %v567_v0  ;;  %v570_v4 = vld [vmem:[#allocation12 + $0x18] sm:$0xff]  ;;  %v571_v6 = vld [vmem:[#allocation12 + $0x20] sm:$0xff] }
  0xee   : > { %v2969_v5 = vpack.c.bf16 %v570_v4, %v569_v2  ;;  %v572_v7 = vld [vmem:[#allocation12 + $0x28] sm:$0xff]  ;;  %v551_v9 = vld [vmem:[%s4007_s23] sm:$0xff]  ;;  %v573_v10 = vld [vmem:[#allocation12 + $0x30] sm:$0xff] }
  0xef   : > { %2966 = vmatprep.subr.bf16.mxu0 %v2965_v3  ;;  %v2973_v8 = vpack.c.bf16 %v572_v7, %v571_v6  ;;  %v574_v11 = vld [vmem:[#allocation12 + $0x38] sm:$0xff]  ;;  %2661 = vmatprep.mubr.f32.mxu0 %v551_v9  ;;  %v575_v13 = vld [vmem:[#allocation12 + $0x40] sm:$0xff]  ;;  %v576_v14 = vld [vmem:[#allocation12 + $0x48] sm:$0xff] }
  0xf0   : > { %2968 = vmatpush3.bf16.msra.mxu0 %v2965_v3  ;;  %v2977_v12 = vpack.c.bf16 %v574_v11, %v573_v10  ;;  %v2981_v15 = vpack.c.bf16 %v576_v14, %v575_v13  ;;  %v577_v16 = vld [vmem:[#allocation12 + $0x50] sm:$0xff]  ;;  %v578_v17 = vld [vmem:[#allocation12 + $0x58] sm:$0xff]  ;;  %v579_v19 = vld [vmem:[#allocation12 + $0x60] sm:$0xff] }
  0xf1   : > { %2970 = vmatprep.subr.bf16.mxu0 %v2969_v5  ;;  %v2985_v18 = vpack.c.bf16 %v578_v17, %v577_v16  ;;  %v580_v20 = vld [vmem:[#allocation12 + $0x68] sm:$0xff]  ;;  %v581_v22 = vld [vmem:[#allocation12 + $0x70] sm:$0xff]  ;;  %v582_v23 = vld [vmem:[#allocation12 + $0x78] sm:$0xff] }
  0xf2   : > { %v2989_v21 = vpack.c.bf16 %v580_v20, %v579_v19  ;;  %v2993_v24 = vpack.c.bf16 %v582_v23, %v581_v22  ;;  %v922_v25 = vld [vmem:[#allocation12 + $0x80] sm:$0xff]  ;;  %v923_v26 = vld [vmem:[#allocation12 + $0x88] sm:$0xff]  ;;  %v924_v28 = vld [vmem:[#allocation12 + $0x90] sm:$0xff] }
  0xf3   : > { %v3029_v27 = vpack.c.bf16 %v923_v26, %v922_v25  ;;  %v925_v29 = vld [vmem:[#allocation12 + $0x98] sm:$0xff]  ;;  %v552_v30 = vld [vmem:[%s4007_s23 + $0x8] sm:$0xff]  ;;  %v535_v31 = vld [vmem:[%s4841_s7] sm:$0xff] }
  0xf4   : > { %2972 = vmatpush3.bf16.msra.mxu0 %v2969_v5  ;;  %v536_v32 = vld [vmem:[%s4841_s7 + $0x8] sm:$0xff]  ;;  %v537_v33 = vld [vmem:[%s4841_s7 + $0x10] sm:$0xff]  ;;  %v3033_v35 = vpack.c.bf16 %v925_v29, %v924_v28  ;;  %v538_v37 = vld [vmem:[%s4841_s7 + $0x18] sm:$0xff] }
  0xf5   : > { %2974 = vmatprep.subr.bf16.mxu0 %v2973_v8  ;;  %v553_v34 = vld [vmem:[%s4007_s23 + $0x10] sm:$0xff]  ;;  %v4052_v36 = vpack.c.bf16 %v536_v32, %v535_v31  ;;  %v926_v38 = vld [vmem:[#allocation12 + $0xa0] sm:$0xff]  ;;  %v927_v39 = vld [vmem:[#allocation12 + $0xa8] sm:$0xff]  ;;  %v4057_v40 = vpack.c.bf16 %v538_v37, %v537_v33 }
  0xf6   : > { %v539_v41 = vld [vmem:[%s4841_s7 + $0x20] sm:$0xff]  ;;  %v540_v42 = vld [vmem:[%s4841_s7 + $0x28] sm:$0xff]  ;;  %v554_v43 = vld [vmem:[%s4007_s23 + $0x18] sm:$0xff]  ;;  %v3037_v45 = vpack.c.bf16 %v927_v39, %v926_v38 }
  0xf7   : > { %2998 = vmatprep.subr.bf16.mxu1 %v4052_v36  ;;  %v555_v44 = vld [vmem:[%s4007_s23 + $0x20] sm:$0xff]  ;;  %v928_v46 = vld [vmem:[#allocation12 + $0xb0] sm:$0xff]  ;;  %v929_v47 = vld [vmem:[#allocation12 + $0xb8] sm:$0xff]  ;;  %v4070_v48 = vpack.c.bf16 %v540_v42, %v539_v41 }
  0xf8   : > { %2976 = vmatpush3.bf16.msra.mxu0 %v2973_v8  ;;  %3000 = vmatpush3.bf16.msra.mxu1 %v4052_v36  ;;  %v541_v49 = vld [vmem:[%s4841_s7 + $0x30] sm:$0xff]  ;;  %v542_v50 = vld [vmem:[%s4841_s7 + $0x38] sm:$0xff]  ;;  %v556_v51 = vld [vmem:[%s4007_s23 + $0x28] sm:$0xff]  ;;  %v3041_v53 = vpack.c.bf16 %v929_v47, %v928_v46 }
  0xf9   : > { %2978 = vmatprep.subr.bf16.mxu0 %v2977_v12  ;;  %3002 = vmatprep.subr.bf16.mxu1 %v4057_v40  ;;  %v557_v52 = vld [vmem:[%s4007_s23 + $0x30] sm:$0xff]  ;;  %v930_v54 = vld [vmem:[#allocation12 + $0xc0] sm:$0xff]  ;;  %v931_v55 = vld [vmem:[#allocation12 + $0xc8] sm:$0xff]  ;;  %v4082_v56 = vpack.c.bf16 %v542_v50, %v541_v49 }
  0xfa   : > { %v543_v57 = vld [vmem:[%s4841_s7 + $0x40] sm:$0xff]  ;;  %v544_v58 = vld [vmem:[%s4841_s7 + $0x48] sm:$0xff]  ;;  %v558_v59 = vld [vmem:[%s4007_s23 + $0x38] sm:$0xff]  ;;  %v3045_v61 = vpack.c.bf16 %v931_v55, %v930_v54 }
  0xfb   : > { %v559_v60 = vld [vmem:[%s4007_s23 + $0x40] sm:$0xff]  ;;  %v932_v62 = vld [vmem:[#allocation12 + $0xd0] sm:$0xff]  ;;  %v933_v63 = vld [vmem:[#allocation12 + $0xd8] sm:$0xff]  ;;  %v4094_v0 = vpack.c.bf16 %v544_v58, %v543_v57 }
  0xfc   : > { %2980 = vmatpush3.bf16.msra.mxu0 %v2977_v12  ;;  %3004 = vmatpush3.bf16.msra.mxu1 %v4057_v40  ;;  %v545_v1 = vld [vmem:[%s4841_s7 + $0x50] sm:$0xff]  ;;  %v546_v2 = vld [vmem:[%s4841_s7 + $0x58] sm:$0xff]  ;;  %v560_v3 = vld [vmem:[%s4007_s23 + $0x48] sm:$0xff]  ;;  %v3049_v5 = vpack.c.bf16 %v933_v63, %v932_v62 }
  0xfd   : > { %2982 = vmatprep.subr.bf16.mxu0 %v2981_v15  ;;  %3006 = vmatprep.subr.bf16.mxu1 %v4070_v48  ;;  %v561_v4 = vld [vmem:[%s4007_s23 + $0x50] sm:$0xff]  ;;  %v934_v6 = vld [vmem:[#allocation12 + $0xe0] sm:$0xff]  ;;  %v935_v7 = vld [vmem:[#allocation12 + $0xe8] sm:$0xff]  ;;  %v4106_v8 = vpack.c.bf16 %v546_v2, %v545_v1 }
  0xfe   : > { %v547_v9 = vld [vmem:[%s4841_s7 + $0x60] sm:$0xff]  ;;  %v548_v10 = vld [vmem:[%s4841_s7 + $0x68] sm:$0xff]  ;;  %v562_v11 = vld [vmem:[%s4007_s23 + $0x58] sm:$0xff]  ;;  %v3053_v13 = vpack.c.bf16 %v935_v7, %v934_v6 }
  0xff   : > { %v563_v12 = vld [vmem:[%s4007_s23 + $0x60] sm:$0xff]  ;;  %v936_v14 = vld [vmem:[#allocation12 + $0xf0] sm:$0xff]  ;;  %v4118_v16 = vpack.c.bf16 %v548_v10, %v547_v9  ;;  %v564_v17 = vld [vmem:[%s4007_s23 + $0x68] sm:$0xff] }
 0x100   : > { %2984 = vmatpush3.bf16.msra.mxu0 %v2981_v15  ;;  %3008 = vmatpush3.bf16.msra.mxu1 %v4070_v48  ;;  %v937_v15 = vld [vmem:[#allocation12 + $0xf8] sm:$0xff]  ;;  %v1277_v20 = vld [vmem:[#allocation12 + $0x100] sm:$0xff]  ;;  %v1279_v25 = vld [vmem:[#allocation12 + $0x110] sm:$0xff] }
 0x101   : > { %2986 = vmatprep.subr.bf16.mxu0 %v2985_v18  ;;  %3010 = vmatprep.subr.bf16.mxu1 %v4082_v56  ;;  %v3057_v19 = vpack.c.bf16 %v937_v15, %v936_v14  ;;  %v566_v22 = vld [vmem:[%s4007_s23 + $0x78] sm:$0xff]  ;;  %v905_v23 = vld [vmem:[%s4014_s12] sm:$0xff]  ;;  %v907_v28 = vld [vmem:[%s4014_s12 + $0x10] sm:$0xff] }
 0x102   : > { %v1280_v26 = vld [vmem:[#allocation12 + $0x118] sm:$0xff]  ;;  %v1282_v31 = vld [vmem:[#allocation12 + $0x128] sm:$0xff]  ;;  %v909_v33 = vld [vmem:[%s4014_s12 + $0x20] sm:$0xff] }
 0x103   : > { %v3097_v29 = vpack.c.bf16 %v1280_v26, %v1279_v25  ;;  %v908_v32 = vld [vmem:[%s4014_s12 + $0x18] sm:$0xff]  ;;  %v910_v38 = vld [vmem:[%s4014_s12 + $0x28] sm:$0xff]  ;;  %v911_v39 = vld [vmem:[%s4014_s12 + $0x30] sm:$0xff] }
 0x104   : > { %2988 = vmatpush3.bf16.msra.mxu0 %v2985_v18  ;;  %3012 = vmatpush3.bf16.msra.mxu1 %v4082_v56  ;;  %v565_v18 = vld [vmem:[%s4007_s23 + $0x70] sm:$0xff]  ;;  %v1284_v37 = vld [vmem:[#allocation12 + $0x138] sm:$0xff]  ;;  %v1285_v42 = vld [vmem:[#allocation12 + $0x140] sm:$0xff] }
 0x105   : > { %2990 = vmatprep.subr.bf16.mxu0 %v2989_v21  ;;  %3014 = vmatprep.subr.bf16.mxu1 %v4094_v0  ;;  %v1287_v47 = vld [vmem:[#allocation12 + $0x150] sm:$0xff]  ;;  %v1288_v49 = vld [vmem:[#allocation12 + $0x158] sm:$0xff]  ;;  %v914_v50 = vld [vmem:[%s4014_s12 + $0x48] sm:$0xff] }
 0x106   : > { %v1290_v54 = vld [vmem:[#allocation12 + $0x168] sm:$0xff]  ;;  %v916_v55 = vld [vmem:[%s4014_s12 + $0x58] sm:$0xff]  ;;  %v917_v57 = vld [vmem:[%s4014_s12 + $0x60] sm:$0xff] }
 0x107   : > { %v919_v62 = vld [vmem:[%s4014_s12 + $0x70] sm:$0xff]  ;;  %v920_v1 = vld [vmem:[%s4014_s12 + $0x78] sm:$0xff]  ;;  %v1260_v2 = vld [vmem:[%s4020_s21] sm:$0xff] }
 0x108   : > { %2992 = vmatpush3.bf16.msra.mxu0 %v2989_v21  ;;  %3016 = vmatpush3.bf16.msra.mxu1 %v4094_v0  ;;  %v1278_v21 = vld [vmem:[#allocation12 + $0x108] sm:$0xff]  ;;  %v1264_v6 = vld [vmem:[%s4020_s21 + $0x20] sm:$0xff]  ;;  %v1266_v9 = vld [vmem:[%s4020_s21 + $0x30] sm:$0xff] }
 0x109   : > { %2994 = vmatprep.subr.bf16.mxu0 %v2993_v24  ;;  %3018 = vmatprep.subr.bf16.mxu1 %v4106_v8  ;;  %v1265_v7 = vld [vmem:[%s4020_s21 + $0x28] sm:$0xff]  ;;  %v1267_v10 = vld [vmem:[%s4020_s21 + $0x38] sm:$0xff]  ;;  %v549_v15 = vld [vmem:[%s4841_s7 + $0x70] sm:$0xff] }
 0x10a   : > { %v1271_v14 = vld [vmem:[%s4020_s21 + $0x58] sm:$0xff]  ;;  %v729_v25 = vld [vmem:[%s4022_s24 + $0x8] sm:$0xff] }
 0x10c   : > { %2996 = vmatpush3.bf16.msra.mxu0 %v2993_v24  ;;  %3020 = vmatpush3.bf16.msra.mxu1 %v4106_v8  ;;  %v3093_v24 = vpack.c.bf16 %v1278_v21, %v1277_v20  ;;  %v1273_v20 = vld [vmem:[%s4020_s21 + $0x68] sm:$0xff]  ;;  %v1274_v21 = vld [vmem:[%s4020_s21 + $0x70] sm:$0xff] }
 0x10d   : > { %3030 = vmatprep.subr.bf16.mxu0 %v3029_v27  ;;  %3022 = vmatprep.subr.bf16.mxu1 %v4118_v16 }
 0x10f   : > { %2662 = vmatmul.mubr.f32.vlgmr.msra.gmra.mrb[0].mxu0 %v552_v30  ;;  %v1281_v30 = vld [vmem:[#allocation12 + $0x120] sm:$0xff] }
 0x110   : > { %3032 = vmatpush3.bf16.msra.mxu0 %v3029_v27  ;;  %2664 = vmatprep.mubr.f32.mxu0 %v553_v34  ;;  %v906_v27 = vld [vmem:[%s4014_s12 + $0x8] sm:$0xff]  ;;  %v3101_v34 = vpack.c.bf16 %v1282_v31, %v1281_v30  ;;  %v731_v31 = vld [vmem:[%s4022_s24 + $0x18] sm:$0xff] }
 0x111   : > { %3034 = vmatprep.subr.bf16.mxu0 %v3033_v35  ;;  %3024 = vmatpush3.bf16.msra.mxu1 %v4118_v16 }
 0x113   : > { %2665 = vmatmul.mubr.f32.gmra.mrb[2].mxu0 %v554_v43  ;;  %v1286_v43 = vld [vmem:[#allocation12 + $0x148] sm:$0xff] }
 0x114   : > { %3036 = vmatpush3.bf16.msra.mxu0 %v3033_v35  ;;  %2667 = vmatprep.mubr.f32.mxu0 %v555_v44  ;;  %v1283_v35 = vld [vmem:[#allocation12 + $0x130] sm:$0xff]  ;;  %v912_v44 = vld [vmem:[%s4014_s12 + $0x38] sm:$0xff]  ;;  %v3109_v46 = vpack.c.bf16 %v1286_v43, %v1285_v42 }
 0x115   : > { %3038 = vmatprep.subr.bf16.mxu0 %v3037_v45  ;;  %v3105_v41 = vpack.c.bf16 %v1284_v37, %v1283_v35  ;;  %v732_v35 = vld [vmem:[%s4022_s24 + $0x20] sm:$0xff]  ;;  %v734_v43 = vld [vmem:[%s4022_s24 + $0x30] sm:$0xff] }
 0x117   : > { %2668 = vmatmul.mubr.f32.gmra.mrb[4].mxu0 %v556_v51  ;;  %v915_v51 = vld [vmem:[%s4014_s12 + $0x50] sm:$0xff] }
 0x118   : > { %3040 = vmatpush3.bf16.msra.mxu0 %v3037_v45  ;;  %2670 = vmatprep.mubr.f32.mxu0 %v557_v52  ;;  %v913_v45 = vld [vmem:[%s4014_s12 + $0x40] sm:$0xff]  ;;  %v3113_v52 = vpack.c.bf16 %v1288_v49, %v1287_v47 }
 0x119   : > { %3042 = vmatprep.subr.bf16.mxu0 %v3041_v53 }
 0x11b   : > { %2671 = vmatmul.mubr.f32.gmra.mrb[6].mxu0 %v558_v59  ;;  %v1291_v59 = vld [vmem:[#allocation12 + $0x170] sm:$0xff] }
 0x11c   : > { %3044 = vmatpush3.bf16.msra.mxu0 %v3041_v53  ;;  %2673 = vmatprep.mubr.f32.mxu0 %v559_v60  ;;  %v1289_v53 = vld [vmem:[#allocation12 + $0x160] sm:$0xff]  ;;  %v1292_v60 = vld [vmem:[#allocation12 + $0x178] sm:$0xff] }
 0x11d   : > { %3046 = vmatprep.subr.bf16.mxu0 %v3045_v61  ;;  %v3117_v58 = vpack.c.bf16 %v1290_v54, %v1289_v53  ;;  %v3121_v63 = vpack.c.bf16 %v1292_v60, %v1291_v59  ;;  %v739_v59 = vld [vmem:[%s4022_s24 + $0x58] sm:$0xff] }
 0x11f   : > { %2674 = vmatmul.mubr.f32.gmra.mrb[8].mxu0 %v560_v3  ;;  %v1261_v3 = vld [vmem:[%s4020_s21 + $0x8] sm:$0xff] }
 0x120   : > { %3048 = vmatpush3.bf16.msra.mxu0 %v3045_v61  ;;  %2676 = vmatprep.mubr.f32.mxu0 %v561_v4  ;;  %v918_v61 = vld [vmem:[%s4014_s12 + $0x68] sm:$0xff]  ;;  %v1262_v4 = vld [vmem:[%s4020_s21 + $0x10] sm:$0xff] }
 0x121   : > { %3050 = vmatprep.subr.bf16.mxu0 %v3049_v5 }
 0x123   : > { %2677 = vmatmul.mubr.f32.gmra.mrb[10].mxu0 %v562_v11  ;;  %v1268_v11 = vld [vmem:[%s4020_s21 + $0x40] sm:$0xff] }
 0x124   : > { %3052 = vmatpush3.bf16.msra.mxu0 %v3049_v5  ;;  %2679 = vmatprep.mubr.f32.mxu0 %v563_v12  ;;  %v1263_v5 = vld [vmem:[%s4020_s21 + $0x18] sm:$0xff]  ;;  %v1269_v12 = vld [vmem:[%s4020_s21 + $0x48] sm:$0xff] }
 0x125   : > { %3054 = vmatprep.subr.bf16.mxu0 %v3053_v13 }
 0x127   : > { %2680 = vmatmul.mubr.f32.gmra.mrb[12].mxu0 %v564_v17  ;;  %v550_v17 = vld [vmem:[%s4841_s7 + $0x78] sm:$0xff] }
 0x128   : > { %3056 = vmatpush3.bf16.msra.mxu0 %v3053_v13  ;;  %2682 = vmatprep.mubr.f32.mxu0 %v565_v18  ;;  %v1270_v13 = vld [vmem:[%s4020_s21 + $0x50] sm:$0xff]  ;;  %v1272_v18 = vld [vmem:[%s4020_s21 + $0x60] sm:$0xff] }
 0x129   : > { %3058 = vmatprep.subr.bf16.mxu0 %v3057_v19 }
 0x12b   : > { %2683 = vmatmul.mubr.f32.gmra.mrb[14].mxu0 %v566_v22  ;;  %v1275_v22 = vld [vmem:[%s4020_s21 + $0x78] sm:$0xff]  ;;  %s3157_s21 = smul.u32 384, %s4003_s30  ;;  %s2436_s30 = sshll.u32 (%p4886_p2), %s3696_s9, 7 }
 0x12c   : > { %3060 = vmatpush3.bf16.msra.mxu0 %v3057_v19  ;;  %2773 = vmatprep.mubr.f32.mxu0 %v905_v23  ;;  %v4161_v19 = vpack.c.bf16 %v550_v17, %v549_v15  ;;  %v728_v23 = vld [vmem:[%s4022_s24] sm:$0xff]  ;;  %v1084_v15 = vld [vmem:[%s4028_s20 + $0x8] sm:$0xff]  ;;  %s4726_s14 = scalar_lea.vmem (%p4886_p2), %s4842_s8, %s2436_s30 }
 0x12d   : > { %3094 = vmatprep.subr.bf16.mxu0 %v3093_v24 }
 0x12e   : > { %3026 = vmatprep.subr.bf16.mxu1 %v4161_v19 }
 0x12f   : > { %2774 = vmatmul.mubr.f32.vlgmr.msra.gmra.mrb[16].mxu0 %v906_v27  ;;  %3028 = vmatpush3.bf16.msra.mxu1 %v4161_v19 }
 0x130   : > { %3096 = vmatpush3.bf16.msra.mxu0 %v3093_v24  ;;  %2776 = vmatprep.mubr.f32.mxu0 %v907_v28 }
 0x131   : > { %3098 = vmatprep.subr.bf16.mxu0 %v3097_v29  ;;  %3062 = vmatprep.subr.bf16.mxu1 %v4052_v36 }
 0x133   : > { %2777 = vmatmul.mubr.f32.gmra.mrb[18].mxu0 %v908_v32 }
 0x134   : > { %3100 = vmatpush3.bf16.msra.mxu0 %v3097_v29  ;;  %2779 = vmatprep.mubr.f32.mxu0 %v909_v33  ;;  %v730_v29 = vld [vmem:[%s4022_s24 + $0x10] sm:$0xff] }
 0x135   : > { %3102 = vmatprep.subr.bf16.mxu0 %v3101_v34 }
 0x137   : > { %2780 = vmatmul.mubr.f32.gmra.mrb[20].mxu0 %v910_v38  ;;  %v733_v38 = vld [vmem:[%s4022_s24 + $0x28] sm:$0xff] }
 0x138   : > { %3104 = vmatpush3.bf16.msra.mxu0 %v3101_v34  ;;  %2782 = vmatprep.mubr.f32.mxu0 %v911_v39 }
 0x139   : > { %3106 = vmatprep.subr.bf16.mxu0 %v3105_v41 }
 0x13b   : > { %2783 = vmatmul.mubr.f32.gmra.mrb[22].mxu0 %v912_v44 }
 0x13c   : > { %3108 = vmatpush3.bf16.msra.mxu0 %v3105_v41  ;;  %2785 = vmatprep.mubr.f32.mxu0 %v913_v45  ;;  %v735_v45 = vld [vmem:[%s4022_s24 + $0x38] sm:$0xff] }
 0x13d   : > { %3110 = vmatprep.subr.bf16.mxu0 %v3109_v46 }
 0x13f   : > { %2786 = vmatmul.mubr.f32.gmra.mrb[24].mxu0 %v914_v50  ;;  %v736_v50 = vld [vmem:[%s4022_s24 + $0x40] sm:$0xff] }
 0x140   : > { %3112 = vmatpush3.bf16.msra.mxu0 %v3109_v46  ;;  %2788 = vmatprep.mubr.f32.mxu0 %v915_v51 }
 0x141   : > { %3114 = vmatprep.subr.bf16.mxu0 %v3113_v52 }
 0x143   : > { %2789 = vmatmul.mubr.f32.gmra.mrb[26].mxu0 %v916_v55 }
 0x144   : > { %3116 = vmatpush3.bf16.msra.mxu0 %v3113_v52  ;;  %2791 = vmatprep.mubr.f32.mxu0 %v917_v57  ;;  %v737_v52 = vld [vmem:[%s4022_s24 + $0x48] sm:$0xff]  ;;  %v738_v57 = vld [vmem:[%s4022_s24 + $0x50] sm:$0xff] }
 0x145   : > { %3118 = vmatprep.subr.bf16.mxu0 %v3117_v58 }
 0x147   : > { %2792 = vmatmul.mubr.f32.gmra.mrb[28].mxu0 %v918_v61 }
 0x148   : > { %3120 = vmatpush3.bf16.msra.mxu0 %v3117_v58  ;;  %2794 = vmatprep.mubr.f32.mxu0 %v919_v62 }
 0x149   : > { %3122 = vmatprep.subr.bf16.mxu0 %v3121_v63 }
 0x14b   : > { %2795 = vmatmul.mubr.f32.gmra.mrb[30].mxu0 %v920_v1 }
 0x14c   : > { %3124 = vmatpush3.bf16.msra.mxu0 %v3121_v63  ;;  %2885 = vmatprep.mubr.f32.mxu0 %v1260_v2  ;;  %v740_v63 = vld [vmem:[%s4022_s24 + $0x60] sm:$0xff]  ;;  %v741_v2 = vld [vmem:[%s4022_s24 + $0x68] sm:$0xff] }
 0x14f   : > { %2886 = vmatmul.mubr.f32.vlgmr.msra.gmra.mrb[32].mxu0 %v1261_v3 }
 0x150   : > { %2888 = vmatprep.mubr.f32.mxu0 %v1262_v4 }
 0x153   : > { %2889 = vmatmul.mubr.f32.gmra.mrb[34].mxu0 %v1263_v5 }
 0x154   : > { %2891 = vmatprep.mubr.f32.mxu0 %v1264_v6  ;;  %v742_v6 = vld [vmem:[%s4022_s24 + $0x70] sm:$0xff] }
 0x157   : > { %2892 = vmatmul.mubr.f32.gmra.mrb[36].mxu0 %v1265_v7 }
 0x158   : > { %2894 = vmatprep.mubr.f32.mxu0 %v1266_v9  ;;  %v743_v9 = vld [vmem:[%s4022_s24 + $0x78] sm:$0xff]  ;;  %s4473_s24 = scalar_lea.vmem [#allocation13], %s3157_s21 }
 0x15b   : > { %2895 = vmatmul.mubr.f32.gmra.mrb[38].mxu0 %v1267_v10 }
 0x15c   : > { %2897 = vmatprep.mubr.f32.mxu0 %v1268_v11 }
 0x15f   : > { %2898 = vmatmul.mubr.f32.gmra.mrb[40].mxu0 %v1269_v12 }
 0x160   : > { %2900 = vmatprep.mubr.f32.mxu0 %v1270_v13  ;;  %v1083_v13 = vld [vmem:[%s4028_s20] sm:$0xff] }
 0x163   : > { %2901 = vmatmul.mubr.f32.gmra.mrb[42].mxu0 %v1271_v14 }
 0x164   : > { %2903 = vmatprep.mubr.f32.mxu0 %v1272_v18 }
 0x167   : > { %2904 = vmatmul.mubr.f32.gmra.mrb[44].mxu0 %v1273_v20 }
 0x168   : > { %2906 = vmatprep.mubr.f32.mxu0 %v1274_v21  ;;  %v1085_v21 = vld [vmem:[%s4028_s20 + $0x10] sm:$0xff] }
 0x16b   : > { %2907 = vmatmul.mubr.f32.gmra.mrb[46].mxu0 %v1275_v22 }
 0x1e2   : > { %v2663_v24 = vpop.f32.mrb[0].mxu0 }
 0x1e3   : > { %v649_v26 = vpop.f32.mrb[1].mxu0  ;;  %v745_v28 = vmul.f32 %v2663_v24, %v729_v25 }
 0x1e4   : > { %v744_v27 = vmul.f32 %v728_v23, %v649_v26  ;;  %v1086_v23 = vld [vmem:[%s4028_s20 + $0x18] sm:$0xff] }
 0x1e6   : > { %v2666_v30 = vpop.f32.mrb[2].mxu0  ;;  %2717 = vmatprep.mubr.f32.mxu1 %v744_v27  ;;  %v1087_v27 = vld [vmem:[%s4028_s20 + $0x20] sm:$0xff] }
 0x1e7   : > { %v659_v32 = vpop.f32.mrb[3].mxu0  ;;  %2718 = vmatmul.mubr.f32.vlgmr.msra.gmra.mrb[0].mxu1 %v745_v28  ;;  %v747_v34 = vmul.f32 %v2666_v30, %v731_v31 }
 0x1e8   : > { %v746_v33 = vmul.f32 %v730_v29, %v659_v32  ;;  %3064 = vmatpush3.bf16.msra.mxu1 %v4052_v36  ;;  %v1088_v29 = vld [vmem:[%s4028_s20 + $0x28] sm:$0xff] }
 0x1e9   : > { %3066 = vmatprep.subr.bf16.mxu1 %v4057_v40 }
 0x1ea   : > { %v2669_v37 = vpop.f32.mrb[4].mxu0  ;;  %2720 = vmatprep.mubr.f32.mxu1 %v746_v33  ;;  %v1089_v33 = vld [vmem:[%s4028_s20 + $0x30] sm:$0xff] }
 0x1eb   : > { %v669_v39 = vpop.f32.mrb[5].mxu0  ;;  %2721 = vmatmul.mubr.f32.gmra.mrb[2].mxu1 %v747_v34  ;;  %v749_v42 = vmul.f32 %v2669_v37, %v733_v38 }
 0x1ec   : > { %v748_v41 = vmul.f32 %v732_v35, %v669_v39  ;;  %3068 = vmatpush3.bf16.msra.mxu1 %v4057_v40  ;;  %v1091_v39 = vld [vmem:[%s4028_s20 + $0x40] sm:$0xff] }
 0x1ed   : > { %3070 = vmatprep.subr.bf16.mxu1 %v4070_v48 }
 0x1ee   : > { %v2672_v44 = vpop.f32.mrb[6].mxu0  ;;  %2723 = vmatprep.mubr.f32.mxu1 %v748_v41 }
 0x1ef   : > { %v679_v46 = vpop.f32.mrb[7].mxu0  ;;  %2724 = vmatmul.mubr.f32.gmra.mrb[4].mxu1 %v749_v42  ;;  %v751_v49 = vmul.f32 %v2672_v44, %v735_v45  ;;  %v1093_v45 = vld [vmem:[%s4028_s20 + $0x50] sm:$0xff] }
 0x1f0   : > { %v750_v47 = vmul.f32 %v734_v43, %v679_v46  ;;  %3072 = vmatpush3.bf16.msra.mxu1 %v4070_v48 }
 0x1f1   : > { %3074 = vmatprep.subr.bf16.mxu1 %v4082_v56 }
 0x1f2   : > { %v2675_v51 = vpop.f32.mrb[8].mxu0  ;;  %2726 = vmatprep.mubr.f32.mxu1 %v750_v47 }
 0x1f3   : > { %v689_v53 = vpop.f32.mrb[9].mxu0  ;;  %2727 = vmatmul.mubr.f32.gmra.mrb[6].mxu1 %v751_v49  ;;  %v753_v55 = vmul.f32 %v2675_v51, %v737_v52  ;;  %v1095_v51 = vld [vmem:[%s4028_s20 + $0x60] sm:$0xff] }
 0x1f4   : > { %v752_v54 = vmul.f32 %v736_v50, %v689_v53  ;;  %3076 = vmatpush3.bf16.msra.mxu1 %v4082_v56 }
 0x1f5   : > { %3078 = vmatprep.subr.bf16.mxu1 %v4094_v0 }
 0x1f6   : > { %v2678_v58 = vpop.f32.mrb[10].mxu0  ;;  %2729 = vmatprep.mubr.f32.mxu1 %v752_v54 }
 0x1f7   : > { %v699_v60 = vpop.f32.mrb[11].mxu0  ;;  %2730 = vmatmul.mubr.f32.gmra.mrb[8].mxu1 %v753_v55  ;;  %v755_v62 = vmul.f32 %v2678_v58, %v739_v59 }
 0x1f8   : > { %v754_v61 = vmul.f32 %v738_v57, %v699_v60  ;;  %3080 = vmatpush3.bf16.msra.mxu1 %v4094_v0  ;;  %v1097_v57 = vld [vmem:[%s4028_s20 + $0x70] sm:$0xff] }
 0x1f9   : > { %3082 = vmatprep.subr.bf16.mxu1 %v4106_v8 }
 0x1fa   : > { %v2681_v1 = vpop.f32.mrb[12].mxu0  ;;  %2732 = vmatprep.mubr.f32.mxu1 %v754_v61 }
 0x1fb   : > { %v709_v3 = vpop.f32.mrb[13].mxu0  ;;  %2733 = vmatmul.mubr.f32.gmra.mrb[10].mxu1 %v755_v62  ;;  %v757_v5 = vmul.f32 %v2681_v1, %v741_v2  ;;  %v1438_v62 = vld [vmem:[%s4030_s19] sm:$0xff] }
 0x1fc   : > { %v756_v4 = vmul.f32 %v740_v63, %v709_v3  ;;  %3084 = vmatpush3.bf16.msra.mxu1 %v4106_v8  ;;  %v1439_v63 = vld [vmem:[%s4030_s19 + $0x8] sm:$0xff] }
 0x1fd   : > { %3086 = vmatprep.subr.bf16.mxu1 %v4118_v16 }
 0x1fe   : > { %v2684_v7 = vpop.f32.mrb[14].mxu0  ;;  %2735 = vmatprep.mubr.f32.mxu1 %v756_v4  ;;  %v1440_v4 = vld [vmem:[%s4030_s19 + $0x10] sm:$0xff] }
 0x1ff   : > { %v719_v10 = vpop.f32.mrb[15].mxu0  ;;  %2736 = vmatmul.mubr.f32.gmra.mrb[12].mxu1 %v757_v5  ;;  %v759_v12 = vmul.f32 %v2684_v7, %v743_v9 }
 0x200   : > { %v758_v11 = vmul.f32 %v742_v6, %v719_v10  ;;  %3088 = vmatpush3.bf16.msra.mxu1 %v4118_v16  ;;  %v1441_v6 = vld [vmem:[%s4030_s19 + $0x18] sm:$0xff]  ;;  %v1442_v10 = vld [vmem:[%s4030_s19 + $0x20] sm:$0xff] }
 0x201   : > { %3090 = vmatprep.subr.bf16.mxu1 %v4161_v19 }
 0x202   : > { %2738 = vmatprep.mubr.f32.mxu1 %v758_v11  ;;  %v2775_v14 = vpop.f32.mrb[16].mxu0 }
 0x203   : > { %2739 = vmatmul.mubr.f32.gmra.mrb[14].mxu1 %v759_v12  ;;  %v1004_v17 = vpop.f32.mrb[17].mxu0  ;;  %v1100_v20 = vmul.f32 %v2775_v14, %v1084_v15  ;;  %v1443_v12 = vld [vmem:[%s4030_s19 + $0x28] sm:$0xff]  ;;  %v1444_v15 = vld [vmem:[%s4030_s19 + $0x30] sm:$0xff] }
 0x204   : > { %v1099_v18 = vmul.f32 %v1083_v13, %v1004_v17  ;;  %3092 = vmatpush3.bf16.msra.mxu1 %v4161_v19 }
 0x205   : > { %3126 = vmatprep.subr.bf16.mxu1 %v4052_v36 }
 0x206   : > { %v2778_v22 = vpop.f32.mrb[18].mxu0  ;;  %2829 = vmatprep.mubr.f32.mxu1 %v1099_v18  ;;  %v1445_v18 = vld [vmem:[%s4030_s19 + $0x38] sm:$0xff] }
 0x207   : > { %v1014_v24 = vpop.f32.mrb[19].mxu0  ;;  %2830 = vmatmul.mubr.f32.vlgmr.msra.gmra.mrb[16].mxu1 %v1100_v20  ;;  %v1102_v26 = vmul.f32 %v2778_v22, %v1086_v23  ;;  %v1446_v23 = vld [vmem:[%s4030_s19 + $0x40] sm:$0xff] }
 0x208   : > { %v1101_v25 = vmul.f32 %v1085_v21, %v1014_v24  ;;  %3128 = vmatpush3.bf16.msra.mxu1 %v4052_v36  ;;  %v1090_v36 = vld [vmem:[%s4028_s20 + $0x38] sm:$0xff] }
 0x209   : > { %3130 = vmatprep.subr.bf16.mxu1 %v4057_v40 }
 0x20a   : > { %v2781_v28 = vpop.f32.mrb[20].mxu0  ;;  %2832 = vmatprep.mubr.f32.mxu1 %v1101_v25  ;;  %v1447_v25 = vld [vmem:[%s4030_s19 + $0x48] sm:$0xff] }
 0x20b   : > { %v1024_v30 = vpop.f32.mrb[21].mxu0  ;;  %2833 = vmatmul.mubr.f32.gmra.mrb[18].mxu1 %v1102_v26  ;;  %v1104_v32 = vmul.f32 %v2781_v28, %v1088_v29  ;;  %v1448_v29 = vld [vmem:[%s4030_s19 + $0x50] sm:$0xff] }
 0x20c   : > { %v1103_v31 = vmul.f32 %v1087_v27, %v1024_v30  ;;  %3132 = vmatpush3.bf16.msra.mxu1 %v4057_v40  ;;  %v1092_v40 = vld [vmem:[%s4028_s20 + $0x48] sm:$0xff] }
 0x20d   : > { %3134 = vmatprep.subr.bf16.mxu1 %v4070_v48 }
 0x20e   : > { %v2784_v34 = vpop.f32.mrb[22].mxu0  ;;  %2835 = vmatprep.mubr.f32.mxu1 %v1103_v31  ;;  %v1449_v31 = vld [vmem:[%s4030_s19 + $0x58] sm:$0xff] }
 0x20f   : > { %v1034_v35 = vpop.f32.mrb[23].mxu0  ;;  %2836 = vmatmul.mubr.f32.gmra.mrb[20].mxu1 %v1104_v32  ;;  %v1106_v38 = vmul.f32 %v2784_v34, %v1090_v36  ;;  %v1450_v36 = vld [vmem:[%s4030_s19 + $0x60] sm:$0xff] }
 0x210   : > { %v1105_v37 = vmul.f32 %v1089_v33, %v1034_v35  ;;  %3136 = vmatpush3.bf16.msra.mxu1 %v4070_v48  ;;  %v1094_v48 = vld [vmem:[%s4028_s20 + $0x58] sm:$0xff] }
 0x211   : > { %3138 = vmatprep.subr.bf16.mxu1 %v4082_v56 }
 0x212   : > { %v2787_v41 = vpop.f32.mrb[24].mxu0  ;;  %2838 = vmatprep.mubr.f32.mxu1 %v1105_v37  ;;  %v1451_v37 = vld [vmem:[%s4030_s19 + $0x68] sm:$0xff] }
 0x213   : > { %v1044_v42 = vpop.f32.mrb[25].mxu0  ;;  %2839 = vmatmul.mubr.f32.gmra.mrb[22].mxu1 %v1106_v38  ;;  %v1108_v44 = vmul.f32 %v2787_v41, %v1092_v40  ;;  %v1452_v40 = vld [vmem:[%s4030_s19 + $0x70] sm:$0xff] }
 0x214   : > { %v1107_v43 = vmul.f32 %v1091_v39, %v1044_v42  ;;  %3140 = vmatpush3.bf16.msra.mxu1 %v4082_v56  ;;  %v1096_v56 = vld [vmem:[%s4028_s20 + $0x68] sm:$0xff] }
 0x215   : > { %3142 = vmatprep.subr.bf16.mxu1 %v4094_v0 }
 0x216   : > { %v2790_v46 = vpop.f32.mrb[26].mxu0  ;;  %2841 = vmatprep.mubr.f32.mxu1 %v1107_v43  ;;  %v1453_v43 = vld [vmem:[%s4030_s19 + $0x78] sm:$0xff] }
 0x217   : > { %v1054_v47 = vpop.f32.mrb[27].mxu0  ;;  %2842 = vmatmul.mubr.f32.gmra.mrb[24].mxu1 %v1108_v44  ;;  %v1110_v50 = vmul.f32 %v2790_v46, %v1094_v48 }
 0x218   : > { %v1109_v49 = vmul.f32 %v1093_v45, %v1054_v47  ;;  %3144 = vmatpush3.bf16.msra.mxu1 %v4094_v0  ;;  %v1098_v0 = vld [vmem:[%s4028_s20 + $0x78] sm:$0xff] }
 0x219   : > { %3146 = vmatprep.subr.bf16.mxu1 %v4106_v8 }
 0x21a   : > { %v2793_v52 = vpop.f32.mrb[28].mxu0  ;;  %2844 = vmatprep.mubr.f32.mxu1 %v1109_v49 }
 0x21b   : > { %v1064_v53 = vpop.f32.mrb[29].mxu0  ;;  %2845 = vmatmul.mubr.f32.gmra.mrb[26].mxu1 %v1110_v50  ;;  %v1112_v55 = vmul.f32 %v2793_v52, %v1096_v56 }
 0x21c   : > { %v1111_v54 = vmul.f32 %v1095_v51, %v1064_v53  ;;  %3148 = vmatpush3.bf16.msra.mxu1 %v4106_v8 }
 0x21d   : > { %3150 = vmatprep.subr.bf16.mxu1 %v4118_v16 }
 0x21e   : > { %v2796_v58 = vpop.f32.mrb[30].mxu0  ;;  %2847 = vmatprep.mubr.f32.mxu1 %v1111_v54 }
 0x21f   : > { %v1074_v59 = vpop.f32.mrb[31].mxu0  ;;  %2848 = vmatmul.mubr.f32.gmra.mrb[28].mxu1 %v1112_v55  ;;  %v1114_v61 = vmul.f32 %v2796_v58, %v1098_v0 }
 0x220   : > { %v1113_v60 = vmul.f32 %v1097_v57, %v1074_v59  ;;  %3152 = vmatpush3.bf16.msra.mxu1 %v4118_v16 }
 0x221   : > { %3154 = vmatprep.subr.bf16.mxu1 %v4161_v19 }
 0x222   : > { %2850 = vmatprep.mubr.f32.mxu1 %v1113_v60  ;;  %v2887_v8 = vpop.f32.mrb[32].mxu0 }
 0x223   : > { %2851 = vmatmul.mubr.f32.gmra.mrb[30].mxu1 %v1114_v61  ;;  %v1359_v1 = vpop.f32.mrb[33].mxu0  ;;  %v1455_v3 = vmul.f32 %v2887_v8, %v1439_v63 }
 0x224   : > { %v1454_v2 = vmul.f32 %v1438_v62, %v1359_v1  ;;  %3156 = vmatpush3.bf16.msra.mxu1 %v4161_v19 }
 0x226   : > { %v2890_v5 = vpop.f32.mrb[34].mxu0  ;;  %2941 = vmatprep.mubr.f32.mxu1 %v1454_v2 }
 0x227   : > { %v1369_v16 = vpop.f32.mrb[35].mxu0  ;;  %2942 = vmatmul.mubr.f32.vlgmr.msra.gmra.mrb[32].mxu1 %v1455_v3  ;;  %v1457_v9 = vmul.f32 %v2890_v5, %v1441_v6 }
 0x228   : > { %v1456_v7 = vmul.f32 %v1440_v4, %v1369_v16 }
 0x22a   : > { %v2893_v11 = vpop.f32.mrb[36].mxu0  ;;  %2944 = vmatprep.mubr.f32.mxu1 %v1456_v7 }
 0x22b   : > { %v1379_v13 = vpop.f32.mrb[37].mxu0  ;;  %2945 = vmatmul.mubr.f32.gmra.mrb[34].mxu1 %v1457_v9  ;;  %v1459_v14 = vmul.f32 %v2893_v11, %v1443_v12 }
 0x22c   : > { %v1458_v19 = vmul.f32 %v1442_v10, %v1379_v13 }
 0x22e   : > { %v2896_v17 = vpop.f32.mrb[38].mxu0  ;;  %2947 = vmatprep.mubr.f32.mxu1 %v1458_v19 }
 0x22f   : > { %v1389_v20 = vpop.f32.mrb[39].mxu0  ;;  %2948 = vmatmul.mubr.f32.gmra.mrb[36].mxu1 %v1459_v14  ;;  %v1461_v22 = vmul.f32 %v2896_v17, %v1445_v18 }
 0x230   : > { %v1460_v21 = vmul.f32 %v1444_v15, %v1389_v20 }
 0x232   : > { %v2899_v24 = vpop.f32.mrb[40].mxu0  ;;  %2950 = vmatprep.mubr.f32.mxu1 %v1460_v21 }
 0x233   : > { %v1399_v26 = vpop.f32.mrb[41].mxu0  ;;  %2951 = vmatmul.mubr.f32.gmra.mrb[38].mxu1 %v1461_v22  ;;  %v1463_v28 = vmul.f32 %v2899_v24, %v1447_v25 }
 0x234   : > { %v1462_v27 = vmul.f32 %v1446_v23, %v1399_v26 }
 0x236   : > { %v2902_v30 = vpop.f32.mrb[42].mxu0  ;;  %2953 = vmatprep.mubr.f32.mxu1 %v1462_v27 }
 0x237   : > { %v1409_v32 = vpop.f32.mrb[43].mxu0  ;;  %2954 = vmatmul.mubr.f32.gmra.mrb[40].mxu1 %v1463_v28  ;;  %v1465_v34 = vmul.f32 %v2902_v30, %v1449_v31 }
 0x238   : > { %v1464_v33 = vmul.f32 %v1448_v29, %v1409_v32 }
 0x23a   : > { %v2905_v35 = vpop.f32.mrb[44].mxu0  ;;  %2956 = vmatprep.mubr.f32.mxu1 %v1464_v33 }
 0x23b   : > { %v1419_v38 = vpop.f32.mrb[45].mxu0  ;;  %2957 = vmatmul.mubr.f32.gmra.mrb[42].mxu1 %v1465_v34  ;;  %v1467_v41 = vmul.f32 %v2905_v35, %v1451_v37 }
 0x23c   : > { %v1466_v39 = vmul.f32 %v1450_v36, %v1419_v38 }
 0x23e   : > { %v2908_v42 = vpop.f32.mrb[46].mxu0  ;;  %2959 = vmatprep.mubr.f32.mxu1 %v1466_v39 }
 0x23f   : > { %v1429_v44 = vpop.f32.mrb[47].mxu0  ;;  %2960 = vmatmul.mubr.f32.gmra.mrb[44].mxu1 %v1467_v41  ;;  %v1469_v46 = vmul.f32 %v2908_v42, %v1453_v43 }
 0x240   : > { %v1468_v45 = vmul.f32 %v1452_v40, %v1429_v44 }
 0x242   : > { %2962 = vmatprep.mubr.f32.mxu1 %v1468_v45 }
 0x243   : > { %2963 = vmatmul.mubr.f32.gmra.mrb[46].mxu1 %v1469_v46 }
 0x2ba   : > { %v2719_v48 = vpop.f32.mrb[0].mxu1 }
 0x2bb   : > { %v826_v47 = vpop.f32.mrb[1].mxu1 }
 0x2be   : > { %v4248_v49 = vpop.f32.mrb[2].mxu1 }
 0x2bf   : > { %v4250_v50 = vpop.f32.mrb[3].mxu1 }
 0x2c2   : > { %v4252_v51 = vpop.f32.mrb[4].mxu1 }
 0x2c3   : > { %v4254_v52 = vpop.f32.mrb[5].mxu1 }
 0x2c6   : > { %v4256_v56 = vpop.f32.mrb[6].mxu1 }
 0x2c7   : > { %v4258_v53 = vpop.f32.mrb[7].mxu1 }
 0x2ca   : > { %v4260_v54 = vpop.f32.mrb[8].mxu1 }
 0x2cb   : > { %v4262_v55 = vpop.f32.mrb[9].mxu1 }
 0x2ce   : > { %v4264_v57 = vpop.f32.mrb[10].mxu1 }
 0x2cf   : > { %v4266_v58 = vpop.f32.mrb[11].mxu1 }
 0x2d2   : > { %v4268_v0 = vpop.f32.mrb[12].mxu1 }
 0x2d3   : > { %v4270_v59 = vpop.f32.mrb[13].mxu1 }
 0x2d6   : > { %v4272_v60 = vpop.f32.mrb[14].mxu1 }
 0x2d7   : > { %v4274_v61 = vpop.f32.mrb[15].mxu1 }
 0x2da   : > { %v2831_v62 = vpop.f32.mrb[16].mxu1 }
 0x2db   : > { %v1616_v8 = vmax.f32 %v2719_v48, %v2831_v62  ;;  %v1181_v63 = vpop.f32.mrb[17].mxu1 }
 0x2dc   : > { %v1615_v1 = vmax.f32 %v826_v47, %v1181_v63 }
 0x2de   : > { %v2834_v2 = vpop.f32.mrb[18].mxu1 }
 0x2df   : > { %v1618_v3 = vmax.f32 %v4248_v49, %v2834_v2  ;;  %v4277_v4 = vpop.f32.mrb[19].mxu1 }
 0x2e0   : > { %v1617_v5 = vmax.f32 %v4250_v50, %v4277_v4 }
 0x2e2   : > { %v4281_v6 = vpop.f32.mrb[20].mxu1 }
 0x2e3   : > { %v1620_v16 = vmax.f32 %v4252_v51, %v4281_v6  ;;  %v4285_v7 = vpop.f32.mrb[21].mxu1 }
 0x2e4   : > { %v1619_v9 = vmax.f32 %v4254_v52, %v4285_v7 }
 0x2e6   : > { %v4289_v10 = vpop.f32.mrb[22].mxu1 }
 0x2e7   : > { %v1622_v11 = vmax.f32 %v4256_v56, %v4289_v10  ;;  %v4293_v12 = vpop.f32.mrb[23].mxu1 }
 0x2e8   : > { %v1621_v13 = vmax.f32 %v4258_v53, %v4293_v12 }
 0x2ea   : > { %v4297_v19 = vpop.f32.mrb[24].mxu1 }
 0x2eb   : > { %v1624_v14 = vmax.f32 %v4260_v54, %v4297_v19  ;;  %v4301_v15 = vpop.f32.mrb[25].mxu1 }
 0x2ec   : > { %v1623_v17 = vmax.f32 %v4262_v55, %v4301_v15 }
 0x2ee   : > { %v4305_v18 = vpop.f32.mrb[26].mxu1 }
 0x2ef   : > { %v1626_v20 = vmax.f32 %v4264_v57, %v4305_v18  ;;  %v4309_v21 = vpop.f32.mrb[27].mxu1 }
 0x2f0   : > { %v1625_v22 = vmax.f32 %v4266_v58, %v4309_v21 }
 0x2f2   : > { %v4313_v23 = vpop.f32.mrb[28].mxu1 }
 0x2f3   : > { %v4317_v25 = vpop.f32.mrb[29].mxu1 }
 0x2f6   : > { %v4321_v27 = vpop.f32.mrb[30].mxu1 }
 0x2f7   : > { %v4325_v29 = vpop.f32.mrb[31].mxu1 }
 0x2fa   : > { %v2943_v31 = vpop.f32.mrb[32].mxu1 }
 0x2fb   : > { %v1632_v32 = vmax.f32 %v1616_v8, %v2943_v31  ;;  %v1536_v33 = vpop.f32.mrb[33].mxu1 }
 0x2fc   : > { %v1631_v34 = vmax.f32 %v1615_v1, %v1536_v33 }
 0x2fd   : > { %v1648_v36 = vsub.f32 %v2719_v48, %v1632_v32  ;;  %v1696_v35 = vsub.f32 %v2831_v62, %v1632_v32  ;;  %v1744_v37 = vsub.f32 %v2943_v31, %v1632_v32 }
 0x2fe   : > { %v1647_v38 = vsub.f32 %v826_v47, %v1631_v34  ;;  %v1695_v39 = vsub.f32 %v1181_v63, %v1631_v34  ;;  %v1743_v41 = vsub.f32 %v1536_v33, %v1631_v34  ;;  %v2946_v40 = vpop.f32.mrb[34].mxu1 }
 0x2ff   : > { %v1665_v42 = vmul.f32 1.442695, %v1648_v36  ;;  %v1713_v43 = vmul.f32 1.442695, %v1696_v35  ;;  %v1761_v44 = vmul.f32 1.442695, %v1744_v37  ;;  %v1634_v45 = vmax.f32 %v1618_v3, %v2946_v40 }
 0x300   : > { %v1663_v46 = vmul.f32 1.442695, %v1647_v38  ;;  %v1711_v28 = vmul.f32 1.442695, %v1695_v39  ;;  %v1546_v24 = vpop.f32.mrb[35].mxu1 }
 0x301   : > { %3235 = vpow2.f32 %v1665_v42  ;;  %v1650_v30 = vsub.f32 %v4248_v49, %v1634_v45  ;;  %v1698_v26 = vsub.f32 %v2834_v2, %v1634_v45  ;;  %v1746_v8 = vsub.f32 %v2946_v40, %v1634_v45 }
 0x302   : > { %3237 = vpow2.f32 %v1713_v43  ;;  %v1759_v48 = vmul.f32 1.442695, %v1743_v41  ;;  %v1633_v62 = vmax.f32 %v1617_v5, %v1546_v24  ;;  %v2949_v1 = vpop.f32.mrb[36].mxu1 }
 0x303   : > { %3239 = vpow2.f32 %v1761_v44  ;;  %v1669_v47 = vmul.f32 1.442695, %v1650_v30  ;;  %v1717_v63 = vmul.f32 1.442695, %v1698_v26  ;;  %v1556_v33 = vpop.f32.mrb[37].mxu1  ;;  %v1636_v49 = vmax.f32 %v1620_v16, %v2949_v1 }
 0x304   : > { %3241 = vpow2.f32 %v1663_v46  ;;  %v1649_v31 = vsub.f32 %v4250_v50, %v1633_v62  ;;  %v1697_v3 = vsub.f32 %v4277_v4, %v1633_v62  ;;  %v1745_v32 = vsub.f32 %v1546_v24, %v1633_v62 }
 0x305   : > { %3243 = vpow2.f32 %v1711_v28  ;;  %v1765_v34 = vmul.f32 1.442695, %v1746_v8  ;;  %v1635_v2 = vmax.f32 %v1619_v9, %v1556_v33  ;;  %v1652_v5 = vsub.f32 %v4252_v51, %v1636_v49 }
 0x306   : > { %3245 = vpow2.f32 %v1759_v48  ;;  %v1667_v36 = vmul.f32 1.442695, %v1649_v31  ;;  %v1715_v35 = vmul.f32 1.442695, %v1697_v3  ;;  %v1763_v37 = vmul.f32 1.442695, %v1745_v32 }
 0x307   : > { %3247 = vpow2.f32 %v1669_v47  ;;  %v1700_v26 = vsub.f32 %v4281_v6, %v1636_v49  ;;  %v1748_v30 = vsub.f32 %v2949_v1, %v1636_v49  ;;  %v2952_v38 = vpop.f32.mrb[38].mxu1  ;;  %v1651_v50 = vsub.f32 %v4254_v52, %v1635_v2 }
 0x308   : > { %3249 = vpow2.f32 %v1717_v63  ;;  %v1699_v4 = vsub.f32 %v4285_v7, %v1635_v2  ;;  %v1747_v24 = vsub.f32 %v1556_v33, %v1635_v2  ;;  %v4336_v28 = vpop.f32.mrb[39].mxu1  ;;  %v1673_v16 = vmul.f32 1.442695, %v1652_v5 }
 0x309   : > { %3251 = vpow2.f32 %v1765_v34  ;;  %v1721_v9 = vmul.f32 1.442695, %v1700_v26  ;;  %v1769_v51 = vmul.f32 1.442695, %v1748_v30  ;;  %v1638_v6 = vmax.f32 %v1622_v11, %v2952_v38 }
 0x30a   : > { %3253 = vpow2.f32 %v1667_v36  ;;  %v4347_v52 = vmax.f32 %v1621_v13, %v4336_v28  ;;  %v4349_v7 = vpop.f32.mrb[40].mxu1  ;;  %v1671_v40 = vmul.f32 1.442695, %v1651_v50  ;;  %v1719_v42 = vmul.f32 1.442695, %v1699_v4 }
 0x30b   : > { %v4338_v39 = vpop.eup %3235  ;;  %3255 = vpow2.f32 %v1715_v35  ;;  %v4357_v43 = vmax.f32 %v1624_v14, %v4349_v7  ;;  %v4359_v11 = vpop.f32.mrb[41].mxu1  ;;  %v1654_v45 = vsub.f32 %v4256_v56, %v1638_v6  ;;  %v1702_v46 = vsub.f32 %v4289_v10, %v1638_v6 }
 0x30c   : > { %v4351_v41 = vpop.eup %3237  ;;  %3257 = vpow2.f32 %v1763_v37  ;;  %v1750_v48 = vsub.f32 %v2952_v38, %v1638_v6  ;;  %v1653_v14 = vsub.f32 %v4258_v53, %v4347_v52  ;;  %v1701_v62 = vsub.f32 %v4293_v12, %v4347_v52 }
 0x30d   : > { %v4361_v44 = vpop.eup %3239  ;;  %v1792_v13 = vadd.f32 %v4351_v41, %v4338_v39  ;;  %3259 = vpow2.f32 %v1673_v16  ;;  %v1767_v56 = vmul.f32 1.442695, %v1747_v24  ;;  %v1677_v53 = vmul.f32 1.442695, %v1654_v45 }
 0x30e   : > { %v4367_v8 = vpop.eup %3241  ;;  %3261 = vpow2.f32 %v1721_v9  ;;  %v4373_v1 = vpop.f32.mrb[42].mxu1  ;;  %v1725_v12 = vmul.f32 1.442695, %v1702_v46  ;;  %v1749_v33 = vsub.f32 %v4336_v28, %v4347_v52  ;;  %v1656_v34 = vsub.f32 %v4260_v54, %v4357_v43 }
 0x30f   : > { %v4375_v47 = vpop.eup %3243  ;;  %v1808_v63 = vadd.f32 %v4361_v44, %v1792_v13  ;;  %3263 = vpow2.f32 %v1769_v51  ;;  %v4378_v31 = vpop.f32.mrb[43].mxu1  ;;  %v1704_v36 = vsub.f32 %v4297_v19, %v4357_v43  ;;  %v1752_v35 = vsub.f32 %v4349_v7, %v4357_v43 }
 0x310   : > { %v4380_v10 = vpop.eup %3245  ;;  %v1791_v3 = vadd.f32 %v4375_v47, %v4367_v8  ;;  %3265 = vpow2.f32 %v1671_v40  ;;  %v1773_v54 = vmul.f32 1.442695, %v1750_v48  ;;  %v1675_v50 = vmul.f32 1.442695, %v1653_v14 }
 0x311   : > { %v4384_v32 = vpop.eup %3247  ;;  %3267 = vrcp.f32 %v1808_v63  ;;  %v1723_v19 = vmul.f32 1.442695, %v1701_v62  ;;  %v1639_v4 = vmax.f32 %v1623_v17, %v4359_v11  ;;  %v4418_v16 = vmax.f32 %v1626_v20, %v4373_v1 }
 0x312   : > { %v4390_v49 = vpop.eup %3249  ;;  %v1807_v2 = vadd.f32 %v4380_v10, %v1791_v3  ;;  %3269 = vpow2.f32 %v1719_v42  ;;  %v4397_v37 = vpop.f32.mrb[44].mxu1  ;;  %v4424_v9 = vmax.f32 %v1625_v22, %v4378_v31  ;;  %v1681_v46 = vmul.f32 1.442695, %v1656_v34 }
 0x313   : > { %v4399_v5 = vpop.eup %3251  ;;  %v1794_v26 = vadd.f32 %v4390_v49, %v4384_v32  ;;  %3271 = vpow2.f32 %v1767_v56  ;;  %v4403_v30 = vpop.f32.mrb[45].mxu1  ;;  %v1655_v6 = vsub.f32 %v4262_v55, %v1639_v4  ;;  %v1703_v52 = vsub.f32 %v4301_v15, %v1639_v4 }
 0x314   : > { %v4405_v38 = vpop.eup %3253  ;;  %3273 = vrcp.f32 %v1807_v2  ;;  %v1751_v40 = vsub.f32 %v4359_v11, %v1639_v4  ;;  %v1658_v22 = vsub.f32 %v4264_v57, %v4418_v16  ;;  %v1706_v42 = vsub.f32 %v4305_v18, %v4418_v16 }
 0x315   : > { %v4411_v24 = vpop.eup %3255  ;;  %v1810_v28 = vadd.f32 %v4399_v5, %v1794_v26  ;;  %3275 = vpow2.f32 %v1677_v53  ;;  %v1771_v15 = vmul.f32 1.442695, %v1749_v33  ;;  %v1729_v14 = vmul.f32 1.442695, %v1704_v36 }
 0x316   : > { %v4426_v51 = vpop.eup %3257  ;;  %v1793_v17 = vadd.f32 %v4411_v24, %v4405_v38  ;;  %3277 = vpow2.f32 %v1725_v12  ;;  %v4432_v7 = vpop.f32.mrb[46].mxu1  ;;  %v1754_v62 = vsub.f32 %v4373_v1, %v4418_v16  ;;  %v1657_v63 = vsub.f32 %v4266_v58, %v4424_v9 }
 0x317   : > { %v4434_v20 = vpop.eup %3259  ;;  %3279 = vrcp.f32 %v1810_v28  ;;  %v4442_v43 = vpop.f32.mrb[47].mxu1  ;;  %v1705_v53 = vsub.f32 %v4309_v21, %v4424_v9  ;;  %v1753_v12 = vsub.f32 %v4378_v31, %v4424_v9  ;;  %v4885_v21 = vmax.f32 %v4274_v61, %v4325_v29 }
 0x318   : > { %v4444_v13 = vpop.eup %3261  ;;  %v1809_v55 = vadd.f32 %v4426_v51, %v1793_v17  ;;  %3281 = vpow2.f32 %v1773_v54 }
 0x319   : > { %v4447_v45 = vpop.eup %3263  ;;  %v1796_v11 = vadd.f32 %v4444_v13, %v4434_v20  ;;  %3283 = vpow2.f32 %v1675_v50  ;;  %v1777_v50 = vmul.f32 1.442695, %v1752_v35 }
 0x31a   : > { %v4451_v48 = vpop.eup %3265  ;;  %3285 = vrcp.f32 %v1809_v55 }
 0x31b   : > { %v3268_v56 = vpop.eup %3267  ;;  %v1812_v3 = vadd.f32 %v4447_v45, %v1796_v11  ;;  %3287 = vpow2.f32 %v1723_v19  ;;  %v1679_v19 = vmul.f32 1.442695, %v1655_v6 }
 0x31c   : > { %v4462_v33 = vpop.eup %3269  ;;  %v1856_v34 = vmul.f32 %v3268_v56, %v4338_v39  ;;  %v1889_v2 = vmul.f32 %v3268_v56, %v4351_v41  ;;  %v1922_v36 = vmul.f32 %v3268_v56, %v4361_v44  ;;  %3289 = vpow2.f32 %v1771_v15 }
 0x31d   : > { %v4467_v26 = vpop.eup %3271  ;;  %3291 = vrcp.f32 %v1812_v3  ;;  %v1795_v54 = vadd.f32 %v4462_v33, %v4451_v48  ;;  %v1727_v39 = vmul.f32 1.442695, %v1703_v52  ;;  %v1775_v41 = vmul.f32 1.442695, %v1751_v40 }
 0x31e   : > { %v3274_v4 = vpop.eup %3273  ;;  %1873 = vst.msk [vmem:[%s4473_s24 + $0x8] sm:$0xff] %vm1871_vm0, %v1856_v34  ;;  %2395 = vst.msk [vmem:[%s4473_s24 + $0x88] sm:$0xff] %vm1871_vm0, %v1889_v2  ;;  %3293 = vpow2.f32 %v1681_v46  ;;  %v4882_v44 = vmax.f32 %v4268_v0, %v4313_v23 }
 0x31f   : > { %2411 = vst.msk [vmem:[%s4473_s24 + $0x108] sm:$0xff] %vm1871_vm0, %v1922_v36  ;;  %v4487_v28 = vpop.eup %3275  ;;  %v1855_v17 = vmul.f32 %v3274_v4, %v4367_v8  ;;  %v1888_v6 = vmul.f32 %v3274_v4, %v4375_v47  ;;  %v1921_v55 = vmul.f32 %v3274_v4, %v4380_v10  ;;  %v1811_v15 = vadd.f32 %v4467_v26, %v1795_v54 }
 0x320   : > { %v4485_v35 = vmax.f32 %v4882_v44, %v4397_v37  ;;  %v4493_v11 = vpop.eup %3277  ;;  %3295 = vpow2.f32 %v1729_v14  ;;  %v4883_v47 = vmax.f32 %v4270_v59, %v4317_v25  ;;  %v4884_v14 = vmax.f32 %v4272_v60, %v4321_v27 }
 0x321   : > { %v3280_v56 = vpop.eup %3279  ;;  %1872 = vst.msk [vmem:[%s4473_s24] sm:$0xff] %vm1871_vm0, %v1855_v17  ;;  %2394 = vst.msk [vmem:[%s4473_s24 + $0x80] sm:$0xff] %vm1871_vm0, %v1888_v6  ;;  %3297 = vrcp.f32 %v1811_v15  ;;  %v1798_v8 = vadd.f32 %v4493_v11, %v4487_v28  ;;  %v1685_v17 = vmul.f32 1.442695, %v1658_v22 }
 0x322   : > { %v1660_v52 = vsub.f32 %v4268_v0, %v4485_v35  ;;  %v1708_v40 = vsub.f32 %v4313_v23, %v4485_v35  ;;  %v1756_v46 = vsub.f32 %v4397_v37, %v4485_v35  ;;  %2410 = vst.msk [vmem:[%s4473_s24 + $0x100] sm:$0xff] %vm1871_vm0, %v1921_v55  ;;  %v4513_v10 = vmax.f32 %v4883_v47, %v4403_v30  ;;  %v4521_v34 = vpop.eup %3281 }
 0x323   : > { %v4519_v3 = vmax.f32 %v4884_v14, %v4432_v7  ;;  %v1858_v2 = vmul.f32 %v3280_v56, %v4384_v32  ;;  %v1891_v36 = vmul.f32 %v3280_v56, %v4390_v49  ;;  %v1924_v54 = vmul.f32 %v3280_v56, %v4399_v5  ;;  %v4526_v4 = vpop.eup %3283 }
 0x324   : > { %3299 = vpow2.f32 %v1777_v50  ;;  %v1814_v44 = vadd.f32 %v4521_v34, %v1798_v8  ;;  %v3286_v6 = vpop.eup %3285  ;;  %v1733_v32 = vmul.f32 1.442695, %v1706_v42  ;;  %v1659_v49 = vsub.f32 %v4270_v59, %v4513_v10 }
 0x325   : > { %3301 = vpow2.f32 %v1679_v19  ;;  %1875 = vst.msk [vmem:[%s4473_s24 + $0x18] sm:$0xff] %vm1871_vm0, %v1858_v2  ;;  %2397 = vst.msk [vmem:[%s4473_s24 + $0x98] sm:$0xff] %vm1871_vm0, %v1891_v36  ;;  %v1707_v57 = vsub.f32 %v4317_v25, %v4513_v10  ;;  %v4545_v5 = vpop.eup %3287  ;;  %v1857_v22 = vmul.f32 %v3286_v6, %v4405_v38  ;;  %v1890_v50 = vmul.f32 %v3286_v6, %v4411_v24 }
 0x326   : > { %2413 = vst.msk [vmem:[%s4473_s24 + $0x118] sm:$0xff] %vm1871_vm0, %v1924_v54  ;;  %3303 = vpow2.f32 %v1727_v39  ;;  %v1923_v19 = vmul.f32 %v3286_v6, %v4426_v51  ;;  %v4550_v39 = vpop.eup %3289  ;;  %v1797_v18 = vadd.f32 %v4545_v5, %v4526_v4  ;;  %v1781_v59 = vmul.f32 1.442695, %v1754_v62 }
 0x327   : > { %3305 = vrcp.f32 %v1814_v44  ;;  %v1683_v42 = vmul.f32 1.442695, %v1657_v63  ;;  %v3292_v38 = vpop.eup %3291  ;;  %1874 = vst.msk [vmem:[%s4473_s24 + $0x10] sm:$0xff] %vm1871_vm0, %v1857_v22  ;;  %2396 = vst.msk [vmem:[%s4473_s24 + $0x90] sm:$0xff] %vm1871_vm0, %v1890_v50  ;;  %v1755_v24 = vsub.f32 %v4403_v30, %v4513_v10  ;;  %v1662_v1 = vsub.f32 %v4272_v60, %v4519_v3 }
 0x328   : > { %3307 = vpow2.f32 %v1775_v41  ;;  %2412 = vst.msk [vmem:[%s4473_s24 + $0x110] sm:$0xff] %vm1871_vm0, %v1923_v19  ;;  %v1710_v58 = vsub.f32 %v4321_v27, %v4519_v3  ;;  %v4572_v16 = vpop.eup %3293  ;;  %v1860_v51 = vmul.f32 %v3292_v38, %v4434_v20  ;;  %v1893_v62 = vmul.f32 %v3292_v38, %v4444_v13 }
 0x329   : > { %3309 = vpow2.f32 %v1685_v17  ;;  %v1926_v63 = vmul.f32 %v3292_v38, %v4447_v45  ;;  %v1813_v41 = vadd.f32 %v4550_v39, %v1797_v18  ;;  %v1731_v30 = vmul.f32 1.442695, %v1705_v53 }
 0x32a   : > { %3311 = vpow2.f32 %v1733_v32  ;;  %v4581_v55 = vpop.eup %3295  ;;  %1877 = vst.msk [vmem:[%s4473_s24 + $0x28] sm:$0xff] %vm1871_vm0, %v1860_v51  ;;  %2399 = vst.msk [vmem:[%s4473_s24 + $0xa8] sm:$0xff] %vm1871_vm0, %v1893_v62  ;;  %v1779_v60 = vmul.f32 1.442695, %v1753_v12  ;;  %v1758_v27 = vsub.f32 %v4432_v7, %v4519_v3  ;;  %v4598_v20 = vmax.f32 %v4885_v21, %v4442_v43 }
 0x32b   : > { %2415 = vst.msk [vmem:[%s4473_s24 + $0x128] sm:$0xff] %vm1871_vm0, %v1926_v63  ;;  %3313 = vrcp.f32 %v1813_v41  ;;  %v3298_v13 = vpop.eup %3297  ;;  %v1800_v45 = vadd.f32 %v4581_v55, %v4572_v16  ;;  %v1689_v31 = vmul.f32 1.442695, %v1660_v52  ;;  %v1737_v8 = vmul.f32 1.442695, %v1708_v40 }
 0x32c   : > { %3315 = vpow2.f32 %v1781_v59  ;;  %v1859_v7 = vmul.f32 %v3298_v13, %v4451_v48  ;;  %v1892_v53 = vmul.f32 %v3298_v13, %v4462_v33  ;;  %v1925_v12 = vmul.f32 %v3298_v13, %v4467_v26 }
 0x32d   : > { %3317 = vpow2.f32 %v1683_v42  ;;  %v1661_v0 = vsub.f32 %v4274_v61, %v4598_v20  ;;  %v1785_v48 = vmul.f32 1.442695, %v1756_v46  ;;  %v1709_v23 = vsub.f32 %v4325_v29, %v4598_v20 }
 0x32e   : > { %v4605_v9 = vpop.eup %3299  ;;  %3319 = vpow2.f32 %v1731_v30  ;;  %1876 = vst.msk [vmem:[%s4473_s24 + $0x20] sm:$0xff] %vm1871_vm0, %v1859_v7  ;;  %2398 = vst.msk [vmem:[%s4473_s24 + $0xa0] sm:$0xff] %vm1871_vm0, %v1892_v53  ;;  %v1757_v61 = vsub.f32 %v4442_v43, %v4598_v20  ;;  %v1687_v40 = vmul.f32 1.442695, %v1659_v49  ;;  %v1735_v43 = vmul.f32 1.442695, %v1707_v57 }
 0x32f   : > { %v4610_v15 = vpop.eup %3301  ;;  %v1816_v56 = vadd.f32 %v4605_v9, %v1800_v45  ;;  %2414 = vst.msk [vmem:[%s4473_s24 + $0x120] sm:$0xff] %vm1871_vm0, %v1925_v12  ;;  %3321 = vpow2.f32 %v1779_v60  ;;  %v1693_v3 = vmul.f32 1.442695, %v1662_v1  ;;  %v1741_v10 = vmul.f32 1.442695, %v1710_v58 }
 0x330   : > { %v4618_v52 = vpop.eup %3303  ;;  %v1789_v49 = vmul.f32 1.442695, %v1758_v27  ;;  %v1691_v22 = vmul.f32 1.442695, %v1661_v0  ;;  %v1739_v38 = vmul.f32 1.442695, %v1709_v23 }
 0x331   : > { %v3306_v33 = vpop.eup %3305  ;;  %3323 = vrcp.f32 %v1816_v56  ;;  %v1799_v26 = vadd.f32 %v4618_v52, %v4610_v15 }
 0x332   : > { %v3308_v47 = vpop.eup %3307  ;;  %v1862_v14 = vmul.f32 %v3306_v33, %v4487_v28  ;;  %v1895_v37 = vmul.f32 %v3306_v33, %v4493_v11  ;;  %v1928_v35 = vmul.f32 %v3306_v33, %v4521_v34  ;;  %3325 = vpow2.f32 %v1689_v31 }
 0x333   : > { %v4638_v29 = vpop.eup %3309  ;;  %v1815_v46 = vadd.f32 %v3308_v47, %v1799_v26  ;;  %3327 = vpow2.f32 %v1737_v8  ;;  %v1783_v28 = vmul.f32 1.442695, %v1755_v24 }
 0x334   : > { %1879 = vst.msk [vmem:[%s4473_s24 + $0x38] sm:$0xff] %vm1871_vm0, %v1862_v14  ;;  %2401 = vst.msk [vmem:[%s4473_s24 + $0xb8] sm:$0xff] %vm1871_vm0, %v1895_v37  ;;  %3329 = vpow2.f32 %v1785_v48  ;;  %v4649_v11 = vpop.eup %3311 }
 0x335   : > { %2417 = vst.msk [vmem:[%s4473_s24 + $0x138] sm:$0xff] %vm1871_vm0, %v1928_v35  ;;  %3331 = vrcp.f32 %v1815_v46  ;;  %v3314_v34 = vpop.eup %3313  ;;  %v1802_v25 = vadd.f32 %v4649_v11, %v4638_v29 }
 0x336   : > { %3333 = vpow2.f32 %v1687_v40  ;;  %v3316_v2 = vpop.eup %3315  ;;  %v1861_v36 = vmul.f32 %v3314_v34, %v4526_v4  ;;  %v1894_v54 = vmul.f32 %v3314_v34, %v4545_v5  ;;  %v1927_v44 = vmul.f32 %v3314_v34, %v4550_v39 }
 0x337   : > { %3335 = vpow2.f32 %v1735_v43  ;;  %v3318_v17 = vpop.eup %3317  ;;  %v1818_v6 = vadd.f32 %v3316_v2, %v1802_v25 }
 0x338   : > { %3337 = vpow2.f32 %v1783_v28  ;;  %v3320_v32 = vpop.eup %3319  ;;  %1878 = vst.msk [vmem:[%s4473_s24 + $0x30] sm:$0xff] %vm1871_vm0, %v1861_v36  ;;  %2400 = vst.msk [vmem:[%s4473_s24 + $0xb0] sm:$0xff] %vm1871_vm0, %v1894_v54  ;;  %v2085_v54 = vld [vmem:[%s4473_s24] sm:$0xff] (%p4886_p2) }
 0x339   : > { %2416 = vst.msk [vmem:[%s4473_s24 + $0x130] sm:$0xff] %vm1871_vm0, %v1927_v44  ;;  %3339 = vpow2.f32 %v1693_v3  ;;  %v3322_v57 = vpop.eup %3321  ;;  %v1801_v4 = vadd.f32 %v3320_v32, %v3318_v17  ;;  %v2087_v44 = vld [vmem:[%s4473_s24 + $0x8] sm:$0xff] (%p4886_p2)  ;;  %2086 = vst [vmem:[%s4726_s14] sm:$0xff] (%p4886_p2), %v2085_v54 }
 0x33a   : > { %3341 = vrcp.f32 %v1818_v6  ;;  %v2091_v6 = vld [vmem:[%s4473_s24 + $0x18] sm:$0xff] (%p4886_p2)  ;;  %2088 = vst [vmem:[%s4726_s14 + $0x8] sm:$0xff] (%p4886_p2), %v2087_v44 }
 0x33b   : > { %v3324_v5 = vpop.eup %3323  ;;  %3343 = vpow2.f32 %v1741_v10  ;;  %v1817_v59 = vadd.f32 %v3322_v57, %v1801_v4  ;;  %2092 = vst [vmem:[%s4726_s14 + $0x18] sm:$0xff] (%p4886_p2), %v2091_v6  ;;  %v2099_v4 = vld [vmem:[%s4473_s24 + $0x38] sm:$0xff] (%p4886_p2) }
 0x33c   : > { %v3326_v50 = vpop.eup %3325  ;;  %v1864_v19 = vmul.f32 %v3324_v5, %v4572_v16  ;;  %v1897_v39 = vmul.f32 %v3324_v5, %v4581_v55  ;;  %v1930_v18 = vmul.f32 %v3324_v5, %v4605_v9  ;;  %3345 = vpow2.f32 %v1789_v49  ;;  %v2095_v49 = vld [vmem:[%s4473_s24 + $0x28] sm:$0xff] (%p4886_p2)  ;;  %2100 = vst [vmem:[%s4726_s14 + $0x38] sm:$0xff] (%p4886_p2), %v2099_v4 }
 0x33d   : > { %v3328_v42 = vpop.eup %3327  ;;  %3347 = vrcp.f32 %v1817_v59  ;;  %v1787_v16 = vmul.f32 1.442695, %v1757_v61  ;;  %2096 = vst [vmem:[%s4726_s14 + $0x28] sm:$0xff] (%p4886_p2), %v2095_v49 }
 0x33e   : > { %v3330_v24 = vpop.eup %3329  ;;  %1881 = vst.msk [vmem:[%s4473_s24 + $0x48] sm:$0xff] %vm1871_vm0, %v1864_v19  ;;  %2403 = vst.msk [vmem:[%s4473_s24 + $0xc8] sm:$0xff] %vm1871_vm0, %v1897_v39  ;;  %v1804_v1 = vadd.f32 %v3328_v42, %v3326_v50  ;;  %3349 = vpow2.f32 %v1691_v22 }
 0x33f   : > { %2419 = vst.msk [vmem:[%s4473_s24 + $0x148] sm:$0xff] %vm1871_vm0, %v1930_v18  ;;  %v3332_v58 = vpop.eup %3331  ;;  %3351 = vpow2.f32 %v1739_v38  ;;  %v2117_v38 = vld [vmem:[%s4473_s24 + $0x80] sm:$0xff] (%p4886_p2) }
 0x340   : > { %v3334_v51 = vpop.eup %3333  ;;  %v1863_v62 = vmul.f32 %v3332_v58, %v4610_v15  ;;  %v1896_v63 = vmul.f32 %v3332_v58, %v4618_v52  ;;  %v1929_v41 = vmul.f32 %v3332_v58, %v3308_v47  ;;  %v1820_v30 = vadd.f32 %v3330_v24, %v1804_v1  ;;  %2118 = vst [vmem:[%s4726_s14 + $0x100] sm:$0xff] (%p4886_p2), %v2117_v38  ;;  %v2121_v1 = vld [vmem:[%s4473_s24 + $0x90] sm:$0xff] (%p4886_p2)  ;;  %v2123_v58 = vld [vmem:[%s4473_s24 + $0x98] sm:$0xff] (%p4886_p2) }
 0x341   : > { %v3336_v55 = vpop.eup %3335  ;;  %2122 = vst [vmem:[%s4726_s14 + $0x110] sm:$0xff] (%p4886_p2), %v2121_v1  ;;  %2124 = vst [vmem:[%s4726_s14 + $0x118] sm:$0xff] (%p4886_p2), %v2123_v58 }
 0x342   : > { %v3338_v60 = vpop.eup %3337  ;;  %1880 = vst.msk [vmem:[%s4473_s24 + $0x40] sm:$0xff] %vm1871_vm0, %v1863_v62  ;;  %2402 = vst.msk [vmem:[%s4473_s24 + $0xc0] sm:$0xff] %vm1871_vm0, %v1896_v63  ;;  %3353 = vrcp.f32 %v1820_v30  ;;  %v1803_v27 = vadd.f32 %v3336_v55, %v3334_v51  ;;  %v2129_v62 = vld [vmem:[%s4473_s24 + $0xb0] sm:$0xff] (%p4886_p2)  ;;  %v2131_v63 = vld [vmem:[%s4473_s24 + $0xb8] sm:$0xff] (%p4886_p2) }
 0x343   : > { %2418 = vst.msk [vmem:[%s4473_s24 + $0x140] sm:$0xff] %vm1871_vm0, %v1929_v41  ;;  %v3340_v21 = vpop.eup %3339  ;;  %3355 = vpow2.f32 %v1787_v16  ;;  %v2125_v16 = vld [vmem:[%s4473_s24 + $0xa0] sm:$0xff] (%p4886_p2)  ;;  %2130 = vst [vmem:[%s4726_s14 + $0x130] sm:$0xff] (%p4886_p2), %v2129_v62 }
 0x344   : > { %v3342_v20 = vpop.eup %3341  ;;  %v1819_v13 = vadd.f32 %v3338_v60, %v1803_v27  ;;  %2126 = vst [vmem:[%s4726_s14 + $0x120] sm:$0xff] (%p4886_p2), %v2125_v16  ;;  %2132 = vst [vmem:[%s4726_s14 + $0x138] sm:$0xff] (%p4886_p2), %v2131_v63 }
 0x345   : > { %v3344_v45 = vpop.eup %3343  ;;  %v1866_v31 = vmul.f32 %v3342_v20, %v4638_v29  ;;  %v1899_v9 = vmul.f32 %v3342_v20, %v4649_v11  ;;  %v1932_v7 = vmul.f32 %v3342_v20, %v3316_v2  ;;  %v2103_v22 = vld [vmem:[%s4473_s24 + $0x48] sm:$0xff] (%p4886_p2) }
 0x346   : > { %3357 = vrcp.f32 %v1819_v13  ;;  %v1806_v53 = vadd.f32 %v3344_v45, %v3340_v21  ;;  %v3346_v12 = vpop.eup %3345  ;;  %2104 = vst [vmem:[%s4726_s14 + $0x48] sm:$0xff] (%p4886_p2), %v2103_v22  ;;  %v2135_v30 = vld [vmem:[%s4473_s24 + $0xc8] sm:$0xff] (%p4886_p2) }
 0x347   : > { %1883 = vst.msk [vmem:[%s4473_s24 + $0x58] sm:$0xff] %vm1871_vm0, %v1866_v31  ;;  %2405 = vst.msk [vmem:[%s4473_s24 + $0xd8] sm:$0xff] %vm1871_vm0, %v1899_v9  ;;  %v3348_v15 = vpop.eup %3347  ;;  %v2151_v31 = vld [vmem:[%s4473_s24 + $0x108] sm:$0xff] (%p4886_p2)  ;;  %v2153_v9 = vld [vmem:[%s4473_s24 + $0x110] sm:$0xff] (%p4886_p2) }
 0x348   : > { %2421 = vst.msk [vmem:[%s4473_s24 + $0x158] sm:$0xff] %vm1871_vm0, %v1932_v7  ;;  %v1822_v56 = vadd.f32 %v3346_v12, %v1806_v53  ;;  %v3350_v8 = vpop.eup %3349  ;;  %v1865_v0 = vmul.f32 %v3348_v15, %v3318_v17  ;;  %v1898_v52 = vmul.f32 %v3348_v15, %v3320_v32  ;;  %v1931_v48 = vmul.f32 %v3348_v15, %v3322_v57  ;;  %v2089_v17 = vld [vmem:[%s4473_s24 + $0x10] sm:$0xff] (%p4886_p2)  ;;  %v2093_v32 = vld [vmem:[%s4473_s24 + $0x20] sm:$0xff] (%p4886_p2)  ;;  %v2155_v7 = vld [vmem:[%s4473_s24 + $0x118] sm:$0xff] (%p4886_p2) }
 0x349   : > { %v3352_v23 = vpop.eup %3351  ;;  %2090 = vst [vmem:[%s4726_s14 + $0x10] sm:$0xff] (%p4886_p2), %v2089_v17  ;;  %2094 = vst [vmem:[%s4726_s14 + $0x20] sm:$0xff] (%p4886_p2), %v2093_v32  ;;  %v2097_v57 = vld [vmem:[%s4473_s24 + $0x30] sm:$0xff] (%p4886_p2)  ;;  %v2101_v5 = vld [vmem:[%s4473_s24 + $0x40] sm:$0xff] (%p4886_p2) }
 0x34a   : > { %3359 = vrcp.f32 %v1822_v56  ;;  %1882 = vst.msk [vmem:[%s4473_s24 + $0x50] sm:$0xff] %vm1871_vm0, %v1865_v0  ;;  %2404 = vst.msk [vmem:[%s4473_s24 + $0xd0] sm:$0xff] %vm1871_vm0, %v1898_v52  ;;  %v1805_v33 = vadd.f32 %v3352_v23, %v3350_v8  ;;  %v2133_v41 = vld [vmem:[%s4473_s24 + $0xc0] sm:$0xff] (%p4886_p2)  ;;  %v2161_v15 = vld [vmem:[%s4473_s24 + $0x130] sm:$0xff] (%p4886_p2) }
 0x34b   : > { %2420 = vst.msk [vmem:[%s4473_s24 + $0x150] sm:$0xff] %vm1871_vm0, %v1931_v48  ;;  %2098 = vst [vmem:[%s4726_s14 + $0x30] sm:$0xff] (%p4886_p2), %v2097_v57  ;;  %v2157_v53 = vld [vmem:[%s4473_s24 + $0x120] sm:$0xff] (%p4886_p2)  ;;  %v2163_v56 = vld [vmem:[%s4473_s24 + $0x138] sm:$0xff] (%p4886_p2) }
 0x34c   : > { %v3354_v61 = vpop.eup %3353  ;;  %2102 = vst [vmem:[%s4726_s14 + $0x40] sm:$0xff] (%p4886_p2), %v2101_v5  ;;  %2134 = vst [vmem:[%s4726_s14 + $0x140] sm:$0xff] (%p4886_p2), %v2133_v41  ;;  %v2167_v0 = vld [vmem:[%s4473_s24 + $0x148] sm:$0xff] (%p4886_p2) }
 0x34d   : > { %v3356_v26 = vpop.eup %3355  ;;  %v1868_v40 = vmul.f32 %v3354_v61, %v3326_v50  ;;  %v1901_v47 = vmul.f32 %v3354_v61, %v3328_v42  ;;  %v1934_v14 = vmul.f32 %v3354_v61, %v3330_v24  ;;  %v2119_v24 = vld [vmem:[%s4473_s24 + $0x88] sm:$0xff] (%p4886_p2)  ;;  %2136 = vst [vmem:[%s4726_s14 + $0x148] sm:$0xff] (%p4886_p2), %v2135_v30  ;;  %2152 = vst [vmem:[%s4726_s14 + $0x208] sm:$0xff] (%p4886_p2), %v2151_v31 }
 0x34e   : > { %v1821_v37 = vadd.f32 %v3356_v26, %v1805_v33  ;;  %v2107_v19 = vld [vmem:[%s4473_s24 + $0x58] sm:$0xff] (%p4886_p2)  ;;  %2120 = vst [vmem:[%s4726_s14 + $0x108] sm:$0xff] (%p4886_p2), %v2119_v24  ;;  %2154 = vst [vmem:[%s4726_s14 + $0x210] sm:$0xff] (%p4886_p2), %v2153_v9 }
 0x34f   : > { %1885 = vst.msk [vmem:[%s4473_s24 + $0x68] sm:$0xff] %vm1871_vm0, %v1868_v40  ;;  %2407 = vst.msk [vmem:[%s4473_s24 + $0xe8] sm:$0xff] %vm1871_vm0, %v1901_v47  ;;  %v2171_v48 = vld [vmem:[%s4473_s24 + $0x158] sm:$0xff] (%p4886_p2) }
 0x350   : > { %2423 = vst.msk [vmem:[%s4473_s24 + $0x168] sm:$0xff] %vm1871_vm0, %v1934_v14  ;;  %v3358_v35 = vpop.eup %3357  ;;  %3361 = vrcp.f32 %v1821_v37  ;;  %2108 = vst [vmem:[%s4726_s14 + $0x58] sm:$0xff] (%p4886_p2), %v2107_v19 }
 0x351   : > { %v1867_v29 = vmul.f32 %v3358_v35, %v3334_v51  ;;  %v1900_v46 = vmul.f32 %v3358_v35, %v3336_v55  ;;  %v1933_v43 = vmul.f32 %v3358_v35, %v3338_v60  ;;  %v2105_v50 = vld [vmem:[%s4473_s24 + $0x50] sm:$0xff] (%p4886_p2)  ;;  %v2127_v51 = vld [vmem:[%s4473_s24 + $0xa8] sm:$0xff] (%p4886_p2)  ;;  %v2139_v60 = vld [vmem:[%s4473_s24 + $0xd8] sm:$0xff] (%p4886_p2)  ;;  %2156 = vst [vmem:[%s4726_s14 + $0x218] sm:$0xff] (%p4886_p2), %v2155_v7 }
 0x352   : > { %2106 = vst [vmem:[%s4726_s14 + $0x50] sm:$0xff] (%p4886_p2), %v2105_v50  ;;  %2128 = vst [vmem:[%s4726_s14 + $0x128] sm:$0xff] (%p4886_p2), %v2127_v51  ;;  %v2137_v55 = vld [vmem:[%s4473_s24 + $0xd0] sm:$0xff] (%p4886_p2) }
 0x353   : > { %1884 = vst.msk [vmem:[%s4473_s24 + $0x60] sm:$0xff] %vm1871_vm0, %v1867_v29  ;;  %2406 = vst.msk [vmem:[%s4473_s24 + $0xe0] sm:$0xff] %vm1871_vm0, %v1900_v46  ;;  %v2169_v52 = vld [vmem:[%s4473_s24 + $0x150] sm:$0xff] (%p4886_p2) }
 0x354   : > { %2422 = vst.msk [vmem:[%s4473_s24 + $0x160] sm:$0xff] %vm1871_vm0, %v1933_v43  ;;  %v3360_v28 = vpop.eup %3359  ;;  %2138 = vst [vmem:[%s4726_s14 + $0x150] sm:$0xff] (%p4886_p2), %v2137_v55 }
 0x355   : > { %v1870_v11 = vmul.f32 %v3360_v28, %v3340_v21  ;;  %v1903_v3 = vmul.f32 %v3360_v28, %v3344_v45  ;;  %v1936_v34 = vmul.f32 %v3360_v28, %v3346_v12  ;;  %2140 = vst [vmem:[%s4726_s14 + $0x158] sm:$0xff] (%p4886_p2), %v2139_v60  ;;  %v2149_v45 = vld [vmem:[%s4473_s24 + $0x100] sm:$0xff] (%p4886_p2)  ;;  %v2159_v12 = vld [vmem:[%s4473_s24 + $0x128] sm:$0xff] (%p4886_p2)  ;;  %2158 = vst [vmem:[%s4726_s14 + $0x220] sm:$0xff] (%p4886_p2), %v2157_v53 }
 0x356   : > { %v2111_v18 = vld [vmem:[%s4473_s24 + $0x68] sm:$0xff] (%p4886_p2)  ;;  %2150 = vst [vmem:[%s4726_s14 + $0x200] sm:$0xff] (%p4886_p2), %v2149_v45  ;;  %2160 = vst [vmem:[%s4726_s14 + $0x228] sm:$0xff] (%p4886_p2), %v2159_v12 }
 0x357   : > { %1887 = vst.msk [vmem:[%s4473_s24 + $0x78] sm:$0xff] %vm1871_vm0, %v1870_v11  ;;  %2409 = vst.msk [vmem:[%s4473_s24 + $0xf8] sm:$0xff] %vm1871_vm0, %v1903_v3  ;;  %v2143_v21 = vld [vmem:[%s4473_s24 + $0xe8] sm:$0xff] (%p4886_p2) }
 0x358   : > { %2425 = vst.msk [vmem:[%s4473_s24 + $0x178] sm:$0xff] %vm1871_vm0, %v1936_v34  ;;  %1960 = sbr.rel (!%p4886_p2) target bundleno = 872 (0x368), region = 84  ;;  %2112 = vst [vmem:[%s4726_s14 + $0x68] sm:$0xff] (%p4886_p2), %v2111_v18  ;;  %v2175_v61 = vld [vmem:[%s4473_s24 + $0x168] sm:$0xff] (%p4886_p2) }
 0x359   : > { %2144 = vst [vmem:[%s4726_s14 + $0x168] sm:$0xff] (%p4886_p2), %v2143_v21  ;;  %2162 = vst [vmem:[%s4726_s14 + $0x230] sm:$0xff] (%p4886_p2), %v2161_v15 }
 0x35a   : > { %v3362_v25 = vpop.eup %3361  ;;  %v2109_v39 = vld [vmem:[%s4473_s24 + $0x60] sm:$0xff] (%p4886_p2)  ;;  %2164 = vst [vmem:[%s4726_s14 + $0x238] sm:$0xff] (%p4886_p2), %v2163_v56  ;;  %2168 = vst [vmem:[%s4726_s14 + $0x248] sm:$0xff] (%p4886_p2), %v2167_v0 }
 0x35b   : > { %v1869_v10 = vmul.f32 %v3362_v25, %v3350_v8  ;;  %v1902_v2 = vmul.f32 %v3362_v25, %v3352_v23  ;;  %v1935_v36 = vmul.f32 %v3362_v25, %v3356_v26  ;;  %2110 = vst [vmem:[%s4726_s14 + $0x60] sm:$0xff] (%p4886_p2), %v2109_v39  ;;  %v2141_v27 = vld [vmem:[%s4473_s24 + $0xe0] sm:$0xff] (%p4886_p2)  ;;  %2170 = vst [vmem:[%s4726_s14 + $0x250] sm:$0xff] (%p4886_p2), %v2169_v52 }
 0x35c   : > { %2142 = vst [vmem:[%s4726_s14 + $0x160] sm:$0xff] (%p4886_p2), %v2141_v27  ;;  %v2165_v8 = vld [vmem:[%s4473_s24 + $0x140] sm:$0xff] (%p4886_p2)  ;;  %2172 = vst [vmem:[%s4726_s14 + $0x258] sm:$0xff] (%p4886_p2), %v2171_v48 }
 0x35d   : > { %1886 = vst.msk [vmem:[%s4473_s24 + $0x70] sm:$0xff] %vm1871_vm0, %v1869_v10  ;;  %2408 = vst.msk [vmem:[%s4473_s24 + $0xf0] sm:$0xff] %vm1871_vm0, %v1902_v2  ;;  %v2173_v23 = vld [vmem:[%s4473_s24 + $0x160] sm:$0xff] (%p4886_p2) }
 0x35e   : > { %2424 = vst.msk [vmem:[%s4473_s24 + $0x170] sm:$0xff] %vm1871_vm0, %v1935_v36  ;;  %v2115_v42 = vld [vmem:[%s4473_s24 + $0x78] sm:$0xff] (%p4886_p2)  ;;  %2166 = vst [vmem:[%s4726_s14 + $0x240] sm:$0xff] (%p4886_p2), %v2165_v8 }
 0x35f   : > { %2116 = vst [vmem:[%s4726_s14 + $0x78] sm:$0xff] %v2115_v42  ;;  %v2147_v13 = vld [vmem:[%s4473_s24 + $0xf8] sm:$0xff]  ;;  %2174 = vst [vmem:[%s4726_s14 + $0x260] sm:$0xff] %v2173_v23 }
 0x360   : > { %2148 = vst [vmem:[%s4726_s14 + $0x178] sm:$0xff] %v2147_v13  ;;  %v2179_v26 = vld [vmem:[%s4473_s24 + $0x178] sm:$0xff]  ;;  %2176 = vst [vmem:[%s4726_s14 + $0x268] sm:$0xff] %v2175_v61 }
 0x361   : > { %2180 = vst [vmem:[%s4726_s14 + $0x278] sm:$0xff] %v2179_v26 }
 0x364   : > { %v2113_v59 = vld [vmem:[%s4473_s24 + $0x70] sm:$0xff] }
 0x365   : > { %2114 = vst [vmem:[%s4726_s14 + $0x70] sm:$0xff] %v2113_v59  ;;  %v2145_v20 = vld [vmem:[%s4473_s24 + $0xf0] sm:$0xff] }
 0x366   : > { %2146 = vst [vmem:[%s4726_s14 + $0x170] sm:$0xff] %v2145_v20  ;;  %v2177_v33 = vld [vmem:[%s4473_s24 + $0x170] sm:$0xff] }
 0x367   : > { %2178 = vst [vmem:[%s4726_s14 + $0x270] sm:$0xff] %v2177_v33 }
 0x368 PF: > { %s4887_s30 = sld [smem:[#allocation20_spill]]  ;;  %s4888_s9 = sld [smem:[#allocation19_spill]] }
 0x369   : > { %s4889_s29 = sld [smem:[#allocation21_spill]]  ;;  %s4890_s27 = smov %s3613_s28 }
 0x36e   : > { %p27_p13 = scmp.ge.s32.totalorder %s4887_s30, 4   ;;  %s4891_s28 = smov %s4888_s9 }
 0x370   :  { %29 = sbr.rel (!%p27_p13) target bundleno = 14 (0xe), region = 199 }
 0x377   :  { %2196 = vsyncpa [#allocation3], 1 }
 0x378   :  { %2198 = vsyncpa [#allocation3 + $0x1], 1 }
 0x379   :  { %2199 = vsyncpa [#allocation5], 1 }
 0x37a   :  { %2201 = vsyncpa [#allocation5 + $0x1], 1 }
 0x37b   :  { %2202 = vsyncpa [#allocation8], 1 }
 0x37c   :  { %2204 = vsyncpa [#allocation8 + $0x1], 1 }
 0x37d   :  { %2205 = vsyncpa [#allocation11], 1 }
 0x37e   :  { %2207 = vsyncpa [#allocation11 + $0x1], 1 }

</bundles_post_ra>
